<compile_context>
chip_gen: v7x
topology: tpu7x:2x2x1
jax: 0.10.0
libtpu: 0.0.40
codegen_flags: <defaults>
</compile_context>

<pallas_src>
import jax
import jax.numpy as jnp
from jax.experimental import pallas as pl
from jax.experimental.pallas import tpu as pltpu

MAX_ORDER = 6
NUM_POLY = sum(o + 1 for o in range(1, MAX_ORDER + 1))          # 27 polynomial terms
NUM_COEFFICIENT = NUM_POLY + MAX_ORDER + 1                      # num_coefficient += max_order + 1 -> 34

# Scaled-down hidden sizes (original: 5000, 4000, 3000, 2000, 1000, 512, 256,
# 128, 64, 32, 16, num_coefficient) — same 12-layer structure, small shapes.
N_HIDDEN = [128, 128, 96, 96, 64, 64, 64, 32, 32, 32, 16, NUM_COEFFICIENT]
N_LAYERS = 11
N_DATA = 128        # original module hard-codes 5000 rows of `data`; scaled down
EPS = 1e-5
WLANES = 128        # lane width of the packed weight / bias slabs

# Sublane row offsets of each layer's weight block inside the packed slab.
# All hidden sizes are multiples of 8, so every block starts sublane-aligned.
ROW_OFF = [0]
for _i in range(N_LAYERS):
    ROW_OFF.append(ROW_OFF[-1] + N_HIDDEN[_i])
W_ROWS = ROW_OFF[-1]                                            # 752


def encoderx_kernel(x_ref, data_ref, w_ref, b_ref, layer11_ref, pred_ref):
    h = x_ref[...]                                   # (1, H1)

    # Layers 1..10: relu(h @ W + b) followed by LayerNorm (identity affine,
    # eps=1e-5, biased variance).  Fused moments: two independent reductions,
    # rsqrt on the EUP.  All math in f32.
    for i in range(N_LAYERS - 1):
        din, dout = N_HIDDEN[i], N_HIDDEN[i + 1]
        off = ROW_OFF[i]
        w = w_ref[off: off + din, 0:dout]                        # (din, dout)
        b = b_ref[i: i + 1, 0:dout]                              # (1, dout)
        y = jnp.dot(h, w, preferred_element_type=jnp.float32) + b
        y = jnp.maximum(y, 0.0)
        mu = jnp.mean(y, axis=-1, keepdims=True)
        ms = jnp.mean(y * y, axis=-1, keepdims=True)
        var = ms - mu * mu
        h = (y - mu) * jax.lax.rsqrt(var + EPS)

    # Layer 11: linear only (no relu, no LayerNorm).  Use the full 128-lane
    # width of the padded weight/bias block so the store is an unmasked vst;
    # columns NUM_COEFFICIENT..127 are exactly zero by construction.
    din, off = N_HIDDEN[10], ROW_OFF[10]
    layer11 = (jnp.dot(h, w_ref[off: off + din, :],
                       preferred_element_type=jnp.float32)
               + b_ref[10:11, :])                                # (1, 128)
    layer11_ref[...] = layer11

    # Polynomial prediction, lane-dense:
    #   pred[n] = sum_{order=1..6} sum_{num=0..order} a[k]*d0^num*d1^(order-num)
    #             + layer_11[-1]
    # Power tables computed jointly on the (2, N) data block (5 muls total),
    # monomial matrix assembled in registers (~4 vregs), one K=27 MXU matmul.
    n = pred_ref.shape[1]
    d = data_ref[...]                                            # (2, N): rows d0, d1
    powers = [jnp.ones((2, n), jnp.float32), d]
    for _ in range(2, MAX_ORDER + 1):
        powers.append(powers[-1] * d)

    terms = []
    for order in range(1, MAX_ORDER + 1):
        for num in range(order + 1):
            if num == 0:
                terms.append(powers[order][1:2, :])              # d1^order
            elif num == order:
                terms.append(powers[order][0:1, :])              # d0^order
            else:
                terms.append(powers[num][0:1, :] * powers[order - num][1:2, :])
    mono = jnp.concatenate(terms, axis=0)                        # (27, N), in registers

    pred = jnp.dot(layer11[:, :NUM_POLY], mono,
                   preferred_element_type=jnp.float32)
    # Coefficient indices 27..32 are unused by the module (its num_coefficient
    # bookkeeping); only layer_11[-1] is added as the bias term.
    pred_ref[...] = pred + layer11[:, NUM_COEFFICIENT - 1: NUM_COEFFICIENT]


def pack_params(weights, biases):
    """One-time packing (init path, NOT per call): all weights sublane-stacked
    into one (752, 128) slab, all biases into one (11, 128) slab."""
    w_pack = jnp.zeros((W_ROWS, WLANES), jnp.float32)
    for i, w in enumerate(weights):
        w_pack = w_pack.at[ROW_OFF[i]: ROW_OFF[i] + w.shape[0],
                           : w.shape[1]].set(w.astype(jnp.float32))
    b_pack = jnp.zeros((N_LAYERS, WLANES), jnp.float32)
    for i, b in enumerate(biases):
        b_pack = b_pack.at[i, : b.shape[0]].set(b.astype(jnp.float32))
    return w_pack, b_pack


@jax.jit
def encoderx_forward(x, data, w_pack, b_pack):
    """x: (H1,), data: (N, 2), packed params. Returns (layer11 (34,), pred (N,))."""
    n = data.shape[0]

    flops = 2 * sum(N_HIDDEN[i] * N_HIDDEN[i + 1] for i in range(N_LAYERS - 1))
    flops += 2 * N_HIDDEN[10] * WLANES                           # padded final layer
    flops += 2 * NUM_POLY * n + 25 * n                           # poly matmul + monomials
    bytes_accessed = 4 * (N_HIDDEN[0] + 2 * n + W_ROWS * WLANES
                          + N_LAYERS * WLANES + WLANES + n)

    vmem = pl.BlockSpec(memory_space=pltpu.MemorySpace.VMEM)
    layer11, pred = pl.pallas_call(
        encoderx_kernel,
        out_shape=(
            jax.ShapeDtypeStruct((1, WLANES), jnp.float32),      # padded layer11
            jax.ShapeDtypeStruct((1, n), jnp.float32),           # lane-dense pred
        ),
        in_specs=[vmem, vmem, vmem, vmem],
        out_specs=(vmem, vmem),
        cost_estimate=pl.CostEstimate(
            flops=flops, transcendentals=10, bytes_accessed=bytes_accessed),
    )(
        x.reshape(1, -1).astype(jnp.float32),
        data.astype(jnp.float32).T,          # (2, N): lane-dense polynomial path
        w_pack,
        b_pack,
    )
    return layer11[0, :NUM_COEFFICIENT], pred[0]


def encoderx_reference(x, data, weights, biases):
    """Pure-JAX reference mirroring the PyTorch forward (two-pass LayerNorm)."""
    h = x
    for i in range(10):
        y = jnp.maximum(h @ weights[i] + biases[i], 0.0)
        mu = jnp.mean(y, axis=-1, keepdims=True)
        var = jnp.mean(jnp.square(y - mu), axis=-1, keepdims=True)
        h = (y - mu) * jax.lax.rsqrt(var + EPS)
    layer11 = h @ weights[10] + biases[10]

    d0 = data[:, 0]
    d1 = data[:, 1]
    pred = jnp.zeros((data.shape[0],), jnp.float32)
    nums = 0
    for order_num in range(1, MAX_ORDER + 1):
        for num in range(order_num + 1):
            pred = pred + layer11[nums] * (d0 ** num) * (d1 ** (order_num - num))
            nums += 1
    pred = pred + layer11[-1]
    return layer11, pred


if __name__ == "__main__":
    key = jax.random.PRNGKey(0)
    n_keys = 1 + 1 + 11 + 11
    keys = jax.random.split(key, n_keys)

    # torch.rand -> uniform [0, 1)
    x = jax.random.uniform(keys[0], (N_HIDDEN[0],), dtype=jnp.float32)
    data = jax.random.uniform(keys[1], (N_DATA, 2), dtype=jnp.float32)
    weights = [
        jax.random.uniform(keys[2 + i], (N_HIDDEN[i], N_HIDDEN[i + 1]), dtype=jnp.float32)
        for i in range(11)
    ]
    biases = [
        jax.random.uniform(keys[13 + i], (N_HIDDEN[i + 1],), dtype=jnp.float32)
        for i in range(11)
    ]

    # Pack once at init (hoisted out of the forward path).
    w_pack, b_pack = pack_params(weights, biases)
    jax.block_until_ready((w_pack, b_pack))

    layer11, pred = encoderx_forward(x, data, w_pack, b_pack)
    jax.block_until_ready((layer11, pred))

    ref_layer11, ref_pred = encoderx_reference(x, data, weights, biases)
    assert layer11.shape == (NUM_COEFFICIENT,)
    assert pred.shape == (N_DATA,)
    assert jnp.allclose(layer11, ref_layer11, rtol=1e-3, atol=1e-3)
    assert jnp.allclose(pred, ref_pred, rtol=1e-3, atol=1e-3)

    print("KERNEL_OK")
</pallas_src>

<mosaic_0001>
module attributes {stable_mosaic.version = 11 : i64} {
  func.func @encoderx_kernel(%arg0: memref<1x128xf32, #tpu.memory_space<vmem>>, %arg1: memref<2x128xf32, #tpu.memory_space<vmem>>, %arg2: memref<752x128xf32, #tpu.memory_space<vmem>>, %arg3: memref<11x128xf32, #tpu.memory_space<vmem>>, %arg4: memref<1x128xf32, #tpu.memory_space<vmem>>, %arg5: memref<1x128xf32, #tpu.memory_space<vmem>>) attributes {dimension_semantics = [], scalar_prefetch = 0 : i64, scratch_operands = 0 : i64, tpu.core_type = #tpu.core_type<tc>} {
    %c0 = arith.constant 0 : index
    %c0_0 = arith.constant 0 : index
    %0 = vector.load %arg0[%c0, %c0_0] : memref<1x128xf32, #tpu.memory_space<vmem>>, vector<1x128xf32>
    %c0_1 = arith.constant 0 : index
    %c0_2 = arith.constant 0 : index
    %1 = vector.load %arg2[%c0_1, %c0_2] : memref<752x128xf32, #tpu.memory_space<vmem>>, vector<128x128xf32>
    %c0_3 = arith.constant 0 : index
    %c0_4 = arith.constant 0 : index
    %2 = vector.load %arg3[%c0_3, %c0_4] : memref<11x128xf32, #tpu.memory_space<vmem>>, vector<1x128xf32>
    %cst = arith.constant dense<0.000000e+00> : vector<1x128xf32>
    %3 = tpu.matmul %0, %1, %cst {dimension_numbers = #tpu.dot_dimension_numbers<[1], [0], [0], [1], [0, 0, 1, 1], [], []>} : vector<1x128xf32>, vector<128x128xf32>, vector<1x128xf32> -> vector<1x128xf32>
    %4 = arith.addf %3, %2 : vector<1x128xf32>
    %cst_5 = arith.constant 0.000000e+00 : f32
    %5 = vector.broadcast %cst_5 : f32 to vector<1x128xf32>
    %6 = arith.maximumf %4, %5 : vector<1x128xf32>
    %cst_6 = arith.constant dense<0.000000e+00> : vector<1xf32>
    %7 = vector.multi_reduction <add>, %6, %cst_6 [1] : vector<1x128xf32> to vector<1xf32>
    %8 = vector.shape_cast %7 : vector<1xf32> to vector<1x1xf32>
    %cst_7 = arith.constant 1.280000e+02 : f32
    %9 = vector.broadcast %cst_7 : f32 to vector<1x1xf32>
    %10 = arith.divf %8, %9 : vector<1x1xf32>
    %11 = arith.mulf %6, %6 : vector<1x128xf32>
    %cst_8 = arith.constant dense<0.000000e+00> : vector<1xf32>
    %12 = vector.multi_reduction <add>, %11, %cst_8 [1] : vector<1x128xf32> to vector<1xf32>
    %13 = vector.shape_cast %12 : vector<1xf32> to vector<1x1xf32>
    %cst_9 = arith.constant 1.280000e+02 : f32
    %14 = vector.broadcast %cst_9 : f32 to vector<1x1xf32>
    %15 = arith.divf %13, %14 : vector<1x1xf32>
    %16 = arith.mulf %10, %10 : vector<1x1xf32>
    %17 = arith.subf %15, %16 : vector<1x1xf32>
    %18 = vector.broadcast %10 : vector<1x1xf32> to vector<1x128xf32>
    %19 = arith.subf %6, %18 : vector<1x128xf32>
    %cst_10 = arith.constant 9.99999974E-6 : f32
    %20 = vector.broadcast %cst_10 : f32 to vector<1x1xf32>
    %21 = arith.addf %17, %20 : vector<1x1xf32>
    %22 = math.rsqrt %21 : vector<1x1xf32>
    %23 = vector.broadcast %22 : vector<1x1xf32> to vector<1x128xf32>
    %24 = arith.mulf %19, %23 : vector<1x128xf32>
    %c128 = arith.constant 128 : index
    %c0_11 = arith.constant 0 : index
    %25 = vector.load %arg2[%c128, %c0_11] : memref<752x128xf32, #tpu.memory_space<vmem>>, vector<128x96xf32>
    %c1 = arith.constant 1 : index
    %c0_12 = arith.constant 0 : index
    %26 = vector.load %arg3[%c1, %c0_12] : memref<11x128xf32, #tpu.memory_space<vmem>>, vector<1x96xf32>
    %cst_13 = arith.constant dense<0.000000e+00> : vector<1x96xf32>
    %27 = tpu.matmul %24, %25, %cst_13 {dimension_numbers = #tpu.dot_dimension_numbers<[1], [0], [0], [1], [0, 0, 1, 1], [], []>} : vector<1x128xf32>, vector<128x96xf32>, vector<1x96xf32> -> vector<1x96xf32>
    %28 = arith.addf %27, %26 : vector<1x96xf32>
    %cst_14 = arith.constant 0.000000e+00 : f32
    %29 = vector.broadcast %cst_14 : f32 to vector<1x96xf32>
    %30 = arith.maximumf %28, %29 : vector<1x96xf32>
    %cst_15 = arith.constant dense<0.000000e+00> : vector<1xf32>
    %31 = vector.multi_reduction <add>, %30, %cst_15 [1] : vector<1x96xf32> to vector<1xf32>
    %32 = vector.shape_cast %31 : vector<1xf32> to vector<1x1xf32>
    %cst_16 = arith.constant 9.600000e+01 : f32
    %33 = vector.broadcast %cst_16 : f32 to vector<1x1xf32>
    %34 = arith.divf %32, %33 : vector<1x1xf32>
    %35 = arith.mulf %30, %30 : vector<1x96xf32>
    %cst_17 = arith.constant dense<0.000000e+00> : vector<1xf32>
    %36 = vector.multi_reduction <add>, %35, %cst_17 [1] : vector<1x96xf32> to vector<1xf32>
    %37 = vector.shape_cast %36 : vector<1xf32> to vector<1x1xf32>
    %cst_18 = arith.constant 9.600000e+01 : f32
    %38 = vector.broadcast %cst_18 : f32 to vector<1x1xf32>
    %39 = arith.divf %37, %38 : vector<1x1xf32>
    %40 = arith.mulf %34, %34 : vector<1x1xf32>
    %41 = arith.subf %39, %40 : vector<1x1xf32>
    %42 = vector.broadcast %34 : vector<1x1xf32> to vector<1x96xf32>
    %43 = arith.subf %30, %42 : vector<1x96xf32>
    %cst_19 = arith.constant 9.99999974E-6 : f32
    %44 = vector.broadcast %cst_19 : f32 to vector<1x1xf32>
    %45 = arith.addf %41, %44 : vector<1x1xf32>
    %46 = math.rsqrt %45 : vector<1x1xf32>
    %47 = vector.broadcast %46 : vector<1x1xf32> to vector<1x96xf32>
    %48 = arith.mulf %43, %47 : vector<1x96xf32>
    %c256 = arith.constant 256 : index
    %c0_20 = arith.constant 0 : index
    %49 = vector.load %arg2[%c256, %c0_20] : memref<752x128xf32, #tpu.memory_space<vmem>>, vector<96x96xf32>
    %c2 = arith.constant 2 : index
    %c0_21 = arith.constant 0 : index
    %50 = vector.load %arg3[%c2, %c0_21] : memref<11x128xf32, #tpu.memory_space<vmem>>, vector<1x96xf32>
    %cst_22 = arith.constant dense<0.000000e+00> : vector<1x96xf32>
    %51 = tpu.matmul %48, %49, %cst_22 {dimension_numbers = #tpu.dot_dimension_numbers<[1], [0], [0], [1], [0, 0, 1, 1], [], []>} : vector<1x96xf32>, vector<96x96xf32>, vector<1x96xf32> -> vector<1x96xf32>
    %52 = arith.addf %51, %50 : vector<1x96xf32>
    %cst_23 = arith.constant 0.000000e+00 : f32
    %53 = vector.broadcast %cst_23 : f32 to vector<1x96xf32>
    %54 = arith.maximumf %52, %53 : vector<1x96xf32>
    %cst_24 = arith.constant dense<0.000000e+00> : vector<1xf32>
    %55 = vector.multi_reduction <add>, %54, %cst_24 [1] : vector<1x96xf32> to vector<1xf32>
    %56 = vector.shape_cast %55 : vector<1xf32> to vector<1x1xf32>
    %cst_25 = arith.constant 9.600000e+01 : f32
    %57 = vector.broadcast %cst_25 : f32 to vector<1x1xf32>
    %58 = arith.divf %56, %57 : vector<1x1xf32>
    %59 = arith.mulf %54, %54 : vector<1x96xf32>
    %cst_26 = arith.constant dense<0.000000e+00> : vector<1xf32>
    %60 = vector.multi_reduction <add>, %59, %cst_26 [1] : vector<1x96xf32> to vector<1xf32>
    %61 = vector.shape_cast %60 : vector<1xf32> to vector<1x1xf32>
    %cst_27 = arith.constant 9.600000e+01 : f32
    %62 = vector.broadcast %cst_27 : f32 to vector<1x1xf32>
    %63 = arith.divf %61, %62 : vector<1x1xf32>
    %64 = arith.mulf %58, %58 : vector<1x1xf32>
    %65 = arith.subf %63, %64 : vector<1x1xf32>
    %66 = vector.broadcast %58 : vector<1x1xf32> to vector<1x96xf32>
    %67 = arith.subf %54, %66 : vector<1x96xf32>
    %cst_28 = arith.constant 9.99999974E-6 : f32
    %68 = vector.broadcast %cst_28 : f32 to vector<1x1xf32>
    %69 = arith.addf %65, %68 : vector<1x1xf32>
    %70 = math.rsqrt %69 : vector<1x1xf32>
    %71 = vector.broadcast %70 : vector<1x1xf32> to vector<1x96xf32>
    %72 = arith.mulf %67, %71 : vector<1x96xf32>
    %c352 = arith.constant 352 : index
    %c0_29 = arith.constant 0 : index
    %73 = vector.load %arg2[%c352, %c0_29] : memref<752x128xf32, #tpu.memory_space<vmem>>, vector<96x64xf32>
    %c3 = arith.constant 3 : index
    %c0_30 = arith.constant 0 : index
    %74 = vector.load %arg3[%c3, %c0_30] : memref<11x128xf32, #tpu.memory_space<vmem>>, vector<1x64xf32>
    %cst_31 = arith.constant dense<0.000000e+00> : vector<1x64xf32>
    %75 = tpu.matmul %72, %73, %cst_31 {dimension_numbers = #tpu.dot_dimension_numbers<[1], [0], [0], [1], [0, 0, 1, 1], [], []>} : vector<1x96xf32>, vector<96x64xf32>, vector<1x64xf32> -> vector<1x64xf32>
    %76 = arith.addf %75, %74 : vector<1x64xf32>
    %cst_32 = arith.constant 0.000000e+00 : f32
    %77 = vector.broadcast %cst_32 : f32 to vector<1x64xf32>
    %78 = arith.maximumf %76, %77 : vector<1x64xf32>
    %cst_33 = arith.constant dense<0.000000e+00> : vector<1xf32>
    %79 = vector.multi_reduction <add>, %78, %cst_33 [1] : vector<1x64xf32> to vector<1xf32>
    %80 = vector.shape_cast %79 : vector<1xf32> to vector<1x1xf32>
    %cst_34 = arith.constant 6.400000e+01 : f32
    %81 = vector.broadcast %cst_34 : f32 to vector<1x1xf32>
    %82 = arith.divf %80, %81 : vector<1x1xf32>
    %83 = arith.mulf %78, %78 : vector<1x64xf32>
    %cst_35 = arith.constant dense<0.000000e+00> : vector<1xf32>
    %84 = vector.multi_reduction <add>, %83, %cst_35 [1] : vector<1x64xf32> to vector<1xf32>
    %85 = vector.shape_cast %84 : vector<1xf32> to vector<1x1xf32>
    %cst_36 = arith.constant 6.400000e+01 : f32
    %86 = vector.broadcast %cst_36 : f32 to vector<1x1xf32>
    %87 = arith.divf %85, %86 : vector<1x1xf32>
    %88 = arith.mulf %82, %82 : vector<1x1xf32>
    %89 = arith.subf %87, %88 : vector<1x1xf32>
    %90 = vector.broadcast %82 : vector<1x1xf32> to vector<1x64xf32>
    %91 = arith.subf %78, %90 : vector<1x64xf32>
    %cst_37 = arith.constant 9.99999974E-6 : f32
    %92 = vector.broadcast %cst_37 : f32 to vector<1x1xf32>
    %93 = arith.addf %89, %92 : vector<1x1xf32>
    %94 = math.rsqrt %93 : vector<1x1xf32>
    %95 = vector.broadcast %94 : vector<1x1xf32> to vector<1x64xf32>
    %96 = arith.mulf %91, %95 : vector<1x64xf32>
    %c448 = arith.constant 448 : index
    %c0_38 = arith.constant 0 : index
    %97 = vector.load %arg2[%c448, %c0_38] : memref<752x128xf32, #tpu.memory_space<vmem>>, vector<64x64xf32>
    %c4 = arith.constant 4 : index
    %c0_39 = arith.constant 0 : index
    %98 = vector.load %arg3[%c4, %c0_39] : memref<11x128xf32, #tpu.memory_space<vmem>>, vector<1x64xf32>
    %cst_40 = arith.constant dense<0.000000e+00> : vector<1x64xf32>
    %99 = tpu.matmul %96, %97, %cst_40 {dimension_numbers = #tpu.dot_dimension_numbers<[1], [0], [0], [1], [0, 0, 1, 1], [], []>} : vector<1x64xf32>, vector<64x64xf32>, vector<1x64xf32> -> vector<1x64xf32>
    %100 = arith.addf %99, %98 : vector<1x64xf32>
    %cst_41 = arith.constant 0.000000e+00 : f32
    %101 = vector.broadcast %cst_41 : f32 to vector<1x64xf32>
    %102 = arith.maximumf %100, %101 : vector<1x64xf32>
    %cst_42 = arith.constant dense<0.000000e+00> : vector<1xf32>
    %103 = vector.multi_reduction <add>, %102, %cst_42 [1] : vector<1x64xf32> to vector<1xf32>
    %104 = vector.shape_cast %103 : vector<1xf32> to vector<1x1xf32>
    %cst_43 = arith.constant 6.400000e+01 : f32
    %105 = vector.broadcast %cst_43 : f32 to vector<1x1xf32>
    %106 = arith.divf %104, %105 : vector<1x1xf32>
    %107 = arith.mulf %102, %102 : vector<1x64xf32>
    %cst_44 = arith.constant dense<0.000000e+00> : vector<1xf32>
    %108 = vector.multi_reduction <add>, %107, %cst_44 [1] : vector<1x64xf32> to vector<1xf32>
    %109 = vector.shape_cast %108 : vector<1xf32> to vector<1x1xf32>
    %cst_45 = arith.constant 6.400000e+01 : f32
    %110 = vector.broadcast %cst_45 : f32 to vector<1x1xf32>
    %111 = arith.divf %109, %110 : vector<1x1xf32>
    %112 = arith.mulf %106, %106 : vector<1x1xf32>
    %113 = arith.subf %111, %112 : vector<1x1xf32>
    %114 = vector.broadcast %106 : vector<1x1xf32> to vector<1x64xf32>
    %115 = arith.subf %102, %114 : vector<1x64xf32>
    %cst_46 = arith.constant 9.99999974E-6 : f32
    %116 = vector.broadcast %cst_46 : f32 to vector<1x1xf32>
    %117 = arith.addf %113, %116 : vector<1x1xf32>
    %118 = math.rsqrt %117 : vector<1x1xf32>
    %119 = vector.broadcast %118 : vector<1x1xf32> to vector<1x64xf32>
    %120 = arith.mulf %115, %119 : vector<1x64xf32>
    %c512 = arith.constant 512 : index
    %c0_47 = arith.constant 0 : index
    %121 = vector.load %arg2[%c512, %c0_47] : memref<752x128xf32, #tpu.memory_space<vmem>>, vector<64x64xf32>
    %c5 = arith.constant 5 : index
    %c0_48 = arith.constant 0 : index
    %122 = vector.load %arg3[%c5, %c0_48] : memref<11x128xf32, #tpu.memory_space<vmem>>, vector<1x64xf32>
    %cst_49 = arith.constant dense<0.000000e+00> : vector<1x64xf32>
    %123 = tpu.matmul %120, %121, %cst_49 {dimension_numbers = #tpu.dot_dimension_numbers<[1], [0], [0], [1], [0, 0, 1, 1], [], []>} : vector<1x64xf32>, vector<64x64xf32>, vector<1x64xf32> -> vector<1x64xf32>
    %124 = arith.addf %123, %122 : vector<1x64xf32>
    %cst_50 = arith.constant 0.000000e+00 : f32
    %125 = vector.broadcast %cst_50 : f32 to vector<1x64xf32>
    %126 = arith.maximumf %124, %125 : vector<1x64xf32>
    %cst_51 = arith.constant dense<0.000000e+00> : vector<1xf32>
    %127 = vector.multi_reduction <add>, %126, %cst_51 [1] : vector<1x64xf32> to vector<1xf32>
    %128 = vector.shape_cast %127 : vector<1xf32> to vector<1x1xf32>
    %cst_52 = arith.constant 6.400000e+01 : f32
    %129 = vector.broadcast %cst_52 : f32 to vector<1x1xf32>
    %130 = arith.divf %128, %129 : vector<1x1xf32>
    %131 = arith.mulf %126, %126 : vector<1x64xf32>
    %cst_53 = arith.constant dense<0.000000e+00> : vector<1xf32>
    %132 = vector.multi_reduction <add>, %131, %cst_53 [1] : vector<1x64xf32> to vector<1xf32>
    %133 = vector.shape_cast %132 : vector<1xf32> to vector<1x1xf32>
    %cst_54 = arith.constant 6.400000e+01 : f32
    %134 = vector.broadcast %cst_54 : f32 to vector<1x1xf32>
    %135 = arith.divf %133, %134 : vector<1x1xf32>
    %136 = arith.mulf %130, %130 : vector<1x1xf32>
    %137 = arith.subf %135, %136 : vector<1x1xf32>
    %138 = vector.broadcast %130 : vector<1x1xf32> to vector<1x64xf32>
    %139 = arith.subf %126, %138 : vector<1x64xf32>
    %cst_55 = arith.constant 9.99999974E-6 : f32
    %140 = vector.broadcast %cst_55 : f32 to vector<1x1xf32>
    %141 = arith.addf %137, %140 : vector<1x1xf32>
    %142 = math.rsqrt %141 : vector<1x1xf32>
    %143 = vector.broadcast %142 : vector<1x1xf32> to vector<1x64xf32>
    %144 = arith.mulf %139, %143 : vector<1x64xf32>
    %c576 = arith.constant 576 : index
    %c0_56 = arith.constant 0 : index
    %145 = vector.load %arg2[%c576, %c0_56] : memref<752x128xf32, #tpu.memory_space<vmem>>, vector<64x32xf32>
    %c6 = arith.constant 6 : index
    %c0_57 = arith.constant 0 : index
    %146 = vector.load %arg3[%c6, %c0_57] : memref<11x128xf32, #tpu.memory_space<vmem>>, vector<1x32xf32>
    %cst_58 = arith.constant dense<0.000000e+00> : vector<1x32xf32>
    %147 = tpu.matmul %144, %145, %cst_58 {dimension_numbers = #tpu.dot_dimension_numbers<[1], [0], [0], [1], [0, 0, 1, 1], [], []>} : vector<1x64xf32>, vector<64x32xf32>, vector<1x32xf32> -> vector<1x32xf32>
    %148 = arith.addf %147, %146 : vector<1x32xf32>
    %cst_59 = arith.constant 0.000000e+00 : f32
    %149 = vector.broadcast %cst_59 : f32 to vector<1x32xf32>
    %150 = arith.maximumf %148, %149 : vector<1x32xf32>
    %cst_60 = arith.constant dense<0.000000e+00> : vector<1xf32>
    %151 = vector.multi_reduction <add>, %150, %cst_60 [1] : vector<1x32xf32> to vector<1xf32>
    %152 = vector.shape_cast %151 : vector<1xf32> to vector<1x1xf32>
    %cst_61 = arith.constant 3.200000e+01 : f32
    %153 = vector.broadcast %cst_61 : f32 to vector<1x1xf32>
    %154 = arith.divf %152, %153 : vector<1x1xf32>
    %155 = arith.mulf %150, %150 : vector<1x32xf32>
    %cst_62 = arith.constant dense<0.000000e+00> : vector<1xf32>
    %156 = vector.multi_reduction <add>, %155, %cst_62 [1] : vector<1x32xf32> to vector<1xf32>
    %157 = vector.shape_cast %156 : vector<1xf32> to vector<1x1xf32>
    %cst_63 = arith.constant 3.200000e+01 : f32
    %158 = vector.broadcast %cst_63 : f32 to vector<1x1xf32>
    %159 = arith.divf %157, %158 : vector<1x1xf32>
    %160 = arith.mulf %154, %154 : vector<1x1xf32>
    %161 = arith.subf %159, %160 : vector<1x1xf32>
    %162 = vector.broadcast %154 : vector<1x1xf32> to vector<1x32xf32>
    %163 = arith.subf %150, %162 : vector<1x32xf32>
    %cst_64 = arith.constant 9.99999974E-6 : f32
    %164 = vector.broadcast %cst_64 : f32 to vector<1x1xf32>
    %165 = arith.addf %161, %164 : vector<1x1xf32>
    %166 = math.rsqrt %165 : vector<1x1xf32>
    %167 = vector.broadcast %166 : vector<1x1xf32> to vector<1x32xf32>
    %168 = arith.mulf %163, %167 : vector<1x32xf32>
    %c640 = arith.constant 640 : index
    %c0_65 = arith.constant 0 : index
    %169 = vector.load %arg2[%c640, %c0_65] : memref<752x128xf32, #tpu.memory_space<vmem>>, vector<32x32xf32>
    %c7 = arith.constant 7 : index
    %c0_66 = arith.constant 0 : index
    %170 = vector.load %arg3[%c7, %c0_66] : memref<11x128xf32, #tpu.memory_space<vmem>>, vector<1x32xf32>
    %cst_67 = arith.constant dense<0.000000e+00> : vector<1x32xf32>
    %171 = tpu.matmul %168, %169, %cst_67 {dimension_numbers = #tpu.dot_dimension_numbers<[1], [0], [0], [1], [0, 0, 1, 1], [], []>} : vector<1x32xf32>, vector<32x32xf32>, vector<1x32xf32> -> vector<1x32xf32>
    %172 = arith.addf %171, %170 : vector<1x32xf32>
    %cst_68 = arith.constant 0.000000e+00 : f32
    %173 = vector.broadcast %cst_68 : f32 to vector<1x32xf32>
    %174 = arith.maximumf %172, %173 : vector<1x32xf32>
    %cst_69 = arith.constant dense<0.000000e+00> : vector<1xf32>
    %175 = vector.multi_reduction <add>, %174, %cst_69 [1] : vector<1x32xf32> to vector<1xf32>
    %176 = vector.shape_cast %175 : vector<1xf32> to vector<1x1xf32>
    %cst_70 = arith.constant 3.200000e+01 : f32
    %177 = vector.broadcast %cst_70 : f32 to vector<1x1xf32>
    %178 = arith.divf %176, %177 : vector<1x1xf32>
    %179 = arith.mulf %174, %174 : vector<1x32xf32>
    %cst_71 = arith.constant dense<0.000000e+00> : vector<1xf32>
    %180 = vector.multi_reduction <add>, %179, %cst_71 [1] : vector<1x32xf32> to vector<1xf32>
    %181 = vector.shape_cast %180 : vector<1xf32> to vector<1x1xf32>
    %cst_72 = arith.constant 3.200000e+01 : f32
    %182 = vector.broadcast %cst_72 : f32 to vector<1x1xf32>
    %183 = arith.divf %181, %182 : vector<1x1xf32>
    %184 = arith.mulf %178, %178 : vector<1x1xf32>
    %185 = arith.subf %183, %184 : vector<1x1xf32>
    %186 = vector.broadcast %178 : vector<1x1xf32> to vector<1x32xf32>
    %187 = arith.subf %174, %186 : vector<1x32xf32>
    %cst_73 = arith.constant 9.99999974E-6 : f32
    %188 = vector.broadcast %cst_73 : f32 to vector<1x1xf32>
    %189 = arith.addf %185, %188 : vector<1x1xf32>
    %190 = math.rsqrt %189 : vector<1x1xf32>
    %191 = vector.broadcast %190 : vector<1x1xf32> to vector<1x32xf32>
    %192 = arith.mulf %187, %191 : vector<1x32xf32>
    %c672 = arith.constant 672 : index
    %c0_74 = arith.constant 0 : index
    %193 = vector.load %arg2[%c672, %c0_74] : memref<752x128xf32, #tpu.memory_space<vmem>>, vector<32x32xf32>
    %c8 = arith.constant 8 : index
    %c0_75 = arith.constant 0 : index
    %194 = vector.load %arg3[%c8, %c0_75] : memref<11x128xf32, #tpu.memory_space<vmem>>, vector<1x32xf32>
    %cst_76 = arith.constant dense<0.000000e+00> : vector<1x32xf32>
    %195 = tpu.matmul %192, %193, %cst_76 {dimension_numbers = #tpu.dot_dimension_numbers<[1], [0], [0], [1], [0, 0, 1, 1], [], []>} : vector<1x32xf32>, vector<32x32xf32>, vector<1x32xf32> -> vector<1x32xf32>
    %196 = arith.addf %195, %194 : vector<1x32xf32>
    %cst_77 = arith.constant 0.000000e+00 : f32
    %197 = vector.broadcast %cst_77 : f32 to vector<1x32xf32>
    %198 = arith.maximumf %196, %197 : vector<1x32xf32>
    %cst_78 = arith.constant dense<0.000000e+00> : vector<1xf32>
    %199 = vector.multi_reduction <add>, %198, %cst_78 [1] : vector<1x32xf32> to vector<1xf32>
    %200 = vector.shape_cast %199 : vector<1xf32> to vector<1x1xf32>
    %cst_79 = arith.constant 3.200000e+01 : f32
    %201 = vector.broadcast %cst_79 : f32 to vector<1x1xf32>
    %202 = arith.divf %200, %201 : vector<1x1xf32>
    %203 = arith.mulf %198, %198 : vector<1x32xf32>
    %cst_80 = arith.constant dense<0.000000e+00> : vector<1xf32>
    %204 = vector.multi_reduction <add>, %203, %cst_80 [1] : vector<1x32xf32> to vector<1xf32>
    %205 = vector.shape_cast %204 : vector<1xf32> to vector<1x1xf32>
    %cst_81 = arith.constant 3.200000e+01 : f32
    %206 = vector.broadcast %cst_81 : f32 to vector<1x1xf32>
    %207 = arith.divf %205, %206 : vector<1x1xf32>
    %208 = arith.mulf %202, %202 : vector<1x1xf32>
    %209 = arith.subf %207, %208 : vector<1x1xf32>
    %210 = vector.broadcast %202 : vector<1x1xf32> to vector<1x32xf32>
    %211 = arith.subf %198, %210 : vector<1x32xf32>
    %cst_82 = arith.constant 9.99999974E-6 : f32
    %212 = vector.broadcast %cst_82 : f32 to vector<1x1xf32>
    %213 = arith.addf %209, %212 : vector<1x1xf32>
    %214 = math.rsqrt %213 : vector<1x1xf32>
    %215 = vector.broadcast %214 : vector<1x1xf32> to vector<1x32xf32>
    %216 = arith.mulf %211, %215 : vector<1x32xf32>
    %c704 = arith.constant 704 : index
    %c0_83 = arith.constant 0 : index
    %217 = vector.load %arg2[%c704, %c0_83] : memref<752x128xf32, #tpu.memory_space<vmem>>, vector<32x16xf32>
    %c9 = arith.constant 9 : index
    %c0_84 = arith.constant 0 : index
    %218 = vector.load %arg3[%c9, %c0_84] : memref<11x128xf32, #tpu.memory_space<vmem>>, vector<1x16xf32>
    %cst_85 = arith.constant dense<0.000000e+00> : vector<1x16xf32>
    %219 = tpu.matmul %216, %217, %cst_85 {dimension_numbers = #tpu.dot_dimension_numbers<[1], [0], [0], [1], [0, 0, 1, 1], [], []>} : vector<1x32xf32>, vector<32x16xf32>, vector<1x16xf32> -> vector<1x16xf32>
    %220 = arith.addf %219, %218 : vector<1x16xf32>
    %cst_86 = arith.constant 0.000000e+00 : f32
    %221 = vector.broadcast %cst_86 : f32 to vector<1x16xf32>
    %222 = arith.maximumf %220, %221 : vector<1x16xf32>
    %cst_87 = arith.constant dense<0.000000e+00> : vector<1xf32>
    %223 = vector.multi_reduction <add>, %222, %cst_87 [1] : vector<1x16xf32> to vector<1xf32>
    %224 = vector.shape_cast %223 : vector<1xf32> to vector<1x1xf32>
    %cst_88 = arith.constant 1.600000e+01 : f32
    %225 = vector.broadcast %cst_88 : f32 to vector<1x1xf32>
    %226 = arith.divf %224, %225 : vector<1x1xf32>
    %227 = arith.mulf %222, %222 : vector<1x16xf32>
    %cst_89 = arith.constant dense<0.000000e+00> : vector<1xf32>
    %228 = vector.multi_reduction <add>, %227, %cst_89 [1] : vector<1x16xf32> to vector<1xf32>
    %229 = vector.shape_cast %228 : vector<1xf32> to vector<1x1xf32>
    %cst_90 = arith.constant 1.600000e+01 : f32
    %230 = vector.broadcast %cst_90 : f32 to vector<1x1xf32>
    %231 = arith.divf %229, %230 : vector<1x1xf32>
    %232 = arith.mulf %226, %226 : vector<1x1xf32>
    %233 = arith.subf %231, %232 : vector<1x1xf32>
    %234 = vector.broadcast %226 : vector<1x1xf32> to vector<1x16xf32>
    %235 = arith.subf %222, %234 : vector<1x16xf32>
    %cst_91 = arith.constant 9.99999974E-6 : f32
    %236 = vector.broadcast %cst_91 : f32 to vector<1x1xf32>
    %237 = arith.addf %233, %236 : vector<1x1xf32>
    %238 = math.rsqrt %237 : vector<1x1xf32>
    %239 = vector.broadcast %238 : vector<1x1xf32> to vector<1x16xf32>
    %240 = arith.mulf %235, %239 : vector<1x16xf32>
    %c736 = arith.constant 736 : index
    %c0_92 = arith.constant 0 : index
    %241 = vector.load %arg2[%c736, %c0_92] : memref<752x128xf32, #tpu.memory_space<vmem>>, vector<16x128xf32>
    %cst_93 = arith.constant dense<0.000000e+00> : vector<1x128xf32>
    %242 = tpu.matmul %240, %241, %cst_93 {dimension_numbers = #tpu.dot_dimension_numbers<[1], [0], [0], [1], [0, 0, 1, 1], [], []>} : vector<1x16xf32>, vector<16x128xf32>, vector<1x128xf32> -> vector<1x128xf32>
    %c10 = arith.constant 10 : index
    %c0_94 = arith.constant 0 : index
    %243 = vector.load %arg3[%c10, %c0_94] : memref<11x128xf32, #tpu.memory_space<vmem>>, vector<1x128xf32>
    %244 = arith.addf %242, %243 : vector<1x128xf32>
    %c0_95 = arith.constant 0 : index
    %c0_96 = arith.constant 0 : index
    %245 = vector.load %arg4[%c0_95, %c0_96] : memref<1x128xf32, #tpu.memory_space<vmem>>, vector<1x128xf32>
    tpu.vector_store %arg4[%c0_95, %c0_96], %244 {strides = array<i32>} : memref<1x128xf32, #tpu.memory_space<vmem>>, vector<1x128xf32>,
    %c0_97 = arith.constant 0 : index
    %c0_98 = arith.constant 0 : index
    %246 = vector.load %arg1[%c0_97, %c0_98] : memref<2x128xf32, #tpu.memory_space<vmem>>, vector<2x128xf32>
    %247 = arith.mulf %246, %246 : vector<2x128xf32>
    %248 = arith.mulf %247, %246 : vector<2x128xf32>
    %249 = arith.mulf %248, %246 : vector<2x128xf32>
    %250 = arith.mulf %249, %246 : vector<2x128xf32>
    %251 = arith.mulf %250, %246 : vector<2x128xf32>
    %252 = vector.extract_strided_slice %246 {offsets = [1, 0], sizes = [1, 128], strides = [1, 1]} : vector<2x128xf32> to vector<1x128xf32>
    %253 = vector.extract_strided_slice %246 {offsets = [0, 0], sizes = [1, 128], strides = [1, 1]} : vector<2x128xf32> to vector<1x128xf32>
    %254 = vector.extract_strided_slice %247 {offsets = [1, 0], sizes = [1, 128], strides = [1, 1]} : vector<2x128xf32> to vector<1x128xf32>
    %255 = vector.extract_strided_slice %246 {offsets = [0, 0], sizes = [1, 128], strides = [1, 1]} : vector<2x128xf32> to vector<1x128xf32>
    %256 = vector.extract_strided_slice %246 {offsets = [1, 0], sizes = [1, 128], strides = [1, 1]} : vector<2x128xf32> to vector<1x128xf32>
    %257 = arith.mulf %255, %256 : vector<1x128xf32>
    %258 = vector.extract_strided_slice %247 {offsets = [0, 0], sizes = [1, 128], strides = [1, 1]} : vector<2x128xf32> to vector<1x128xf32>
    %259 = vector.extract_strided_slice %248 {offsets = [1, 0], sizes = [1, 128], strides = [1, 1]} : vector<2x128xf32> to vector<1x128xf32>
    %260 = vector.extract_strided_slice %246 {offsets = [0, 0], sizes = [1, 128], strides = [1, 1]} : vector<2x128xf32> to vector<1x128xf32>
    %261 = vector.extract_strided_slice %247 {offsets = [1, 0], sizes = [1, 128], strides = [1, 1]} : vector<2x128xf32> to vector<1x128xf32>
    %262 = arith.mulf %260, %261 : vector<1x128xf32>
    %263 = vector.extract_strided_slice %247 {offsets = [0, 0], sizes = [1, 128], strides = [1, 1]} : vector<2x128xf32> to vector<1x128xf32>
    %264 = vector.extract_strided_slice %246 {offsets = [1, 0], sizes = [1, 128], strides = [1, 1]} : vector<2x128xf32> to vector<1x128xf32>
    %265 = arith.mulf %263, %264 : vector<1x128xf32>
    %266 = vector.extract_strided_slice %248 {offsets = [0, 0], sizes = [1, 128], strides = [1, 1]} : vector<2x128xf32> to vector<1x128xf32>
    %267 = vector.extract_strided_slice %249 {offsets = [1, 0], sizes = [1, 128], strides = [1, 1]} : vector<2x128xf32> to vector<1x128xf32>
    %268 = vector.extract_strided_slice %246 {offsets = [0, 0], sizes = [1, 128], strides = [1, 1]} : vector<2x128xf32> to vector<1x128xf32>
    %269 = vector.extract_strided_slice %248 {offsets = [1, 0], sizes = [1, 128], strides = [1, 1]} : vector<2x128xf32> to vector<1x128xf32>
    %270 = arith.mulf %268, %269 : vector<1x128xf32>
    %271 = vector.extract_strided_slice %247 {offsets = [0, 0], sizes = [1, 128], strides = [1, 1]} : vector<2x128xf32> to vector<1x128xf32>
    %272 = vector.extract_strided_slice %247 {offsets = [1, 0], sizes = [1, 128], strides = [1, 1]} : vector<2x128xf32> to vector<1x128xf32>
    %273 = arith.mulf %271, %272 : vector<1x128xf32>
    %274 = vector.extract_strided_slice %248 {offsets = [0, 0], sizes = [1, 128], strides = [1, 1]} : vector<2x128xf32> to vector<1x128xf32>
    %275 = vector.extract_strided_slice %246 {offsets = [1, 0], sizes = [1, 128], strides = [1, 1]} : vector<2x128xf32> to vector<1x128xf32>
    %276 = arith.mulf %274, %275 : vector<1x128xf32>
    %277 = vector.extract_strided_slice %249 {offsets = [0, 0], sizes = [1, 128], strides = [1, 1]} : vector<2x128xf32> to vector<1x128xf32>
    %278 = vector.extract_strided_slice %250 {offsets = [1, 0], sizes = [1, 128], strides = [1, 1]} : vector<2x128xf32> to vector<1x128xf32>
    %279 = vector.extract_strided_slice %246 {offsets = [0, 0], sizes = [1, 128], strides = [1, 1]} : vector<2x128xf32> to vector<1x128xf32>
    %280 = vector.extract_strided_slice %249 {offsets = [1, 0], sizes = [1, 128], strides = [1, 1]} : vector<2x128xf32> to vector<1x128xf32>
    %281 = arith.mulf %279, %280 : vector<1x128xf32>
    %282 = vector.extract_strided_slice %247 {offsets = [0, 0], sizes = [1, 128], strides = [1, 1]} : vector<2x128xf32> to vector<1x128xf32>
    %283 = vector.extract_strided_slice %248 {offsets = [1, 0], sizes = [1, 128], strides = [1, 1]} : vector<2x128xf32> to vector<1x128xf32>
    %284 = arith.mulf %282, %283 : vector<1x128xf32>
    %285 = vector.extract_strided_slice %248 {offsets = [0, 0], sizes = [1, 128], strides = [1, 1]} : vector<2x128xf32> to vector<1x128xf32>
    %286 = vector.extract_strided_slice %247 {offsets = [1, 0], sizes = [1, 128], strides = [1, 1]} : vector<2x128xf32> to vector<1x128xf32>
    %287 = arith.mulf %285, %286 : vector<1x128xf32>
    %288 = vector.extract_strided_slice %249 {offsets = [0, 0], sizes = [1, 128], strides = [1, 1]} : vector<2x128xf32> to vector<1x128xf32>
    %289 = vector.extract_strided_slice %246 {offsets = [1, 0], sizes = [1, 128], strides = [1, 1]} : vector<2x128xf32> to vector<1x128xf32>
    %290 = arith.mulf %288, %289 : vector<1x128xf32>
    %291 = vector.extract_strided_slice %250 {offsets = [0, 0], sizes = [1, 128], strides = [1, 1]} : vector<2x128xf32> to vector<1x128xf32>
    %292 = vector.extract_strided_slice %251 {offsets = [1, 0], sizes = [1, 128], strides = [1, 1]} : vector<2x128xf32> to vector<1x128xf32>
    %293 = vector.extract_strided_slice %246 {offsets = [0, 0], sizes = [1, 128], strides = [1, 1]} : vector<2x128xf32> to vector<1x128xf32>
    %294 = vector.extract_strided_slice %250 {offsets = [1, 0], sizes = [1, 128], strides = [1, 1]} : vector<2x128xf32> to vector<1x128xf32>
    %295 = arith.mulf %293, %294 : vector<1x128xf32>
    %296 = vector.extract_strided_slice %247 {offsets = [0, 0], sizes = [1, 128], strides = [1, 1]} : vector<2x128xf32> to vector<1x128xf32>
    %297 = vector.extract_strided_slice %249 {offsets = [1, 0], sizes = [1, 128], strides = [1, 1]} : vector<2x128xf32> to vector<1x128xf32>
    %298 = arith.mulf %296, %297 : vector<1x128xf32>
    %299 = vector.extract_strided_slice %248 {offsets = [0, 0], sizes = [1, 128], strides = [1, 1]} : vector<2x128xf32> to vector<1x128xf32>
    %300 = vector.extract_strided_slice %248 {offsets = [1, 0], sizes = [1, 128], strides = [1, 1]} : vector<2x128xf32> to vector<1x128xf32>
    %301 = arith.mulf %299, %300 : vector<1x128xf32>
    %302 = vector.extract_strided_slice %249 {offsets = [0, 0], sizes = [1, 128], strides = [1, 1]} : vector<2x128xf32> to vector<1x128xf32>
    %303 = vector.extract_strided_slice %247 {offsets = [1, 0], sizes = [1, 128], strides = [1, 1]} : vector<2x128xf32> to vector<1x128xf32>
    %304 = arith.mulf %302, %303 : vector<1x128xf32>
    %305 = vector.extract_strided_slice %250 {offsets = [0, 0], sizes = [1, 128], strides = [1, 1]} : vector<2x128xf32> to vector<1x128xf32>
    %306 = vector.extract_strided_slice %246 {offsets = [1, 0], sizes = [1, 128], strides = [1, 1]} : vector<2x128xf32> to vector<1x128xf32>
    %307 = arith.mulf %305, %306 : vector<1x128xf32>
    %308 = vector.extract_strided_slice %251 {offsets = [0, 0], sizes = [1, 128], strides = [1, 1]} : vector<2x128xf32> to vector<1x128xf32>
    %309 = tpu.concatenate %252, %253, %254, %257, %258, %259, %262, %265, %266, %267, %270, %273, %276, %277, %278, %281 in 0 : vector<1x128xf32>, vector<1x128xf32>, vector<1x128xf32>, vector<1x128xf32>, vector<1x128xf32>, vector<1x128xf32>, vector<1x128xf32>, vector<1x128xf32>, vector<1x128xf32>, vector<1x128xf32>, vector<1x128xf32>, vector<1x128xf32>, vector<1x128xf32>, vector<1x128xf32>, vector<1x128xf32>, vector<1x128xf32> -> vector<16x128xf32>
    %310 = tpu.concatenate %284, %287, %290, %291, %292, %295, %298, %301, %304, %307, %308 in 0 : vector<1x128xf32>, vector<1x128xf32>, vector<1x128xf32>, vector<1x128xf32>, vector<1x128xf32>, vector<1x128xf32>, vector<1x128xf32>, vector<1x128xf32>, vector<1x128xf32>, vector<1x128xf32>, vector<1x128xf32> -> vector<11x128xf32>
    %311 = tpu.concatenate %309, %310 in 0 : vector<16x128xf32>, vector<11x128xf32> -> vector<27x128xf32>
    %312 = vector.extract_strided_slice %244 {offsets = [0, 0], sizes = [1, 27], strides = [1, 1]} : vector<1x128xf32> to vector<1x27xf32>
    %cst_99 = arith.constant dense<0.000000e+00> : vector<1x128xf32>
    %313 = tpu.matmul %312, %311, %cst_99 {dimension_numbers = #tpu.dot_dimension_numbers<[1], [0], [0], [1], [0, 0, 1, 1], [], []>} : vector<1x27xf32>, vector<27x128xf32>, vector<1x128xf32> -> vector<1x128xf32>
    %314 = vector.extract_strided_slice %244 {offsets = [0, 33], sizes = [1, 1], strides = [1, 1]} : vector<1x128xf32> to vector<1x1xf32>
    %315 = vector.broadcast %314 : vector<1x1xf32> to vector<1x128xf32>
    %316 = arith.addf %313, %315 : vector<1x128xf32>
    %c0_100 = arith.constant 0 : index
    %c0_101 = arith.constant 0 : index
    %317 = vector.load %arg5[%c0_100, %c0_101] : memref<1x128xf32, #tpu.memory_space<vmem>>, vector<1x128xf32>
    tpu.vector_store %arg5[%c0_100, %c0_101], %316 {strides = array<i32>} : memref<1x128xf32, #tpu.memory_space<vmem>>, vector<1x128xf32>,
    return
  }
}

</mosaic_0001>

<bundles_post_ra>
// kernel: encoderx_forward.1
= control target key start
LH: loop header
LB: loop body
LE: loop exit
PB: predicated region body
PF: predicated region fallthrough
CT: control target
= control target key end

     0   :  { %11 = vsyncpa [#allocation3], 0  ;;  %s2265_s0 = inlined_call_operand.hbm [shape: f32[1,128], index: 0, kind: input, shape index: {}]   ;;  %s2266_s1 = inlined_call_operand.vmem [shape: f32[2,128], index: 1, kind: input, shape index: {}]   ;;  %s2267_s2 = inlined_call_operand.hbm [shape: f32[752,128], index: 2, kind: input, shape index: {}]   ;;  %s2268_s3 = inlined_call_operand.vmem [shape: f32[11,128], index: 3, kind: input, shape index: {}]   ;;  %s2269_s4 = inlined_call_operand.vmem [shape: f32[1,128], index: 4, kind: output, shape index: {0}]   ;;  %s2270_s5 = inlined_call_operand.hbm [shape: f32[1,128], index: 5, kind: output, shape index: {1}]  }
   0x1   :  { %12 = vsyncpa [#allocation6], 0 }
   0x2   :  { %13 = vsyncpa [#allocation4], 0  ;;  %s1953_s18 = smov [#allocation2]   ;;  %s1954_s20 = smov [#allocation5]  }
   0x3   :  { %s20_s19 = sshll.u32 %s1953_s18, 4  ;;  %s31_s21 = sshll.u32 %s1954_s20, 4  ;;  %s21_s19 = int_to_ptr.vmem [resolvable:$true] %s20_s19  ;;  %s1993_s21 = int_to_ptr.vmem [resolvable:$true] %s31_s21 }
   0x4   :  { %s1881_s24 = scalar_lea.hbm %s2265_s0, 16 }
   0x5   :  { %p1882_p0 = scmp.ne.s32.totalorder %s2265_s0, %s1881_s24  ;;  %p1885_p1 = scmp.lt.u32.totalorder %s1881_s24, %s2265_s0 }
   0x7   :  { %p1887_p2 = pnand %p1885_p1, %p1882_p0 }
   0x9   :  { %1890 = shalt.err (!%p1887_p2)
}
   0xa   :  { %s1891_s29 = scalar_lea.vmem %s21_s19, 16  ;;  %s1895_s30 = scalar_lea.vmem %s21_s19, 32 }
   0xb   :  { %p1892_p3 = scmp.ne.s32.totalorder %s21_s19, %s1891_s29  ;;  %p1896_p4 = scmp.lt.s32.totalorder %s21_s19, %s21_s19 }
   0xc   :  { %p1897_p5 = scmp.lt.s32.totalorder %s1895_s30, %s1891_s29 }
   0xe   :  { %p1898_p6 = por %p1897_p5, %p1896_p4 }
  0x10   :  { %p1899_p7 = pnand %p1898_p6, %p1892_p3 }
  0x12   :  { %1902 = shalt.err (!%p1899_p7)
}
  0x13   :  { %23 = dma.hbm_to_vmem [thread:$0]  %s2265_s0, 16, %s21_s19, [#allocation3]  }
  0x14   :  { %s1903_s10 = scalar_lea.hbm %s2267_s2, 12032 }
  0x15   :  { %p1904_p8 = scmp.ne.s32.totalorder %s2267_s2, %s1903_s10  ;;  %p1907_p9 = scmp.lt.u32.totalorder %s1903_s10, %s2267_s2 }
  0x17   :  { %p1909_p10 = pnand %p1907_p9, %p1904_p8 }
  0x19   :  { %1912 = shalt.err (!%p1909_p10)
}
  0x1a   :  { %s1913_s15 = scalar_lea.vmem %s1993_s21, 12032  ;;  %p1918_p12 = scmp.lt.s32.totalorder %s1993_s21, %s1993_s21 }
  0x1b   :  { %p1914_p11 = scmp.ne.s32.totalorder %s1993_s21, %s1913_s15  ;;  %p1919_p13 = scmp.lt.s32.totalorder %s1913_s15, %s1913_s15 }
  0x1d   :  { %p1920_p0 = por %p1919_p13, %p1918_p12 }
  0x1f   :  { %p1921_p1 = pnand %p1920_p0, %p1914_p11 }
  0x21   :  { %1924 = shalt.err (!%p1921_p1)
}
  0x22   :  { %s1955_s0 = smov 128   ;;  %s1956_s16 = smov 8  }
  0x23   :  { %37 = dma.hbm_to_vmem [thread:$0]  %s2267_s2, 12032, %s1993_s21, [#allocation6], %s1955_s0, %s1955_s0, %s1956_s16  }
  0x24   :  { %1947 = dma.done.wait [#allocation3], 16  }
  0x25   :  { %1948 = vsyncadd [#allocation3], 4294967280 }
  0x26   :  { %1949 = dma.done.wait [#allocation6], 12032  }
  0x27   :  { %1950 = vsyncadd [#allocation6], 4294955264  ;;  %v1957_v0 = vmov 0.0|0.0   ;;  %vm1958_vm0 = vmmov 0   ;;  %v1959_v1 = vmov 0.0   ;;  %v47_v2 = vld [vmem:[#allocation5] sm:$0xff] }
  0x28   :  { %1702 = vmatprep.subr.bf16.mxu0 %v1957_v0  ;;  %1502 = vmatprep.mubr.msk.f32.mxu0 %vm1958_vm0, %v1959_v1  ;;  %v48_v3 = vld [vmem:[#allocation5 + $0x8] sm:$0xff]  ;;  %v49_v4 = vld [vmem:[#allocation5 + $0x10] sm:$0xff]  ;;  %v50_v6 = vld [vmem:[#allocation5 + $0x18] sm:$0xff]  ;;  %vm135_vm1 = vcmask 1040384   ;;  %vm240_vm2 = vcmask 778240   ;;  %vm270_vm3 = vcmask 785408  }
  0x29   :  { %1726 = vmatprep.subr.bf16.mxu1 %v1957_v0  ;;  %1537 = vmatprep.mubr.msk.f32.mxu1 %vm1958_vm0, %v1959_v1  ;;  %v1703_v5 = vpack.c.bf16 %v48_v3, %v47_v2  ;;  %v1706_v7 = vpack.c.bf16 %v50_v6, %v49_v4  ;;  %v51_v8 = vld [vmem:[#allocation5 + $0x20] sm:$0xff]  ;;  %v52_v9 = vld [vmem:[#allocation5 + $0x28] sm:$0xff]  ;;  %v53_v11 = vld [vmem:[#allocation5 + $0x30] sm:$0xff]  ;;  %vm447_vm4 = vcmask 516096   ;;  %vm473_vm5 = vcmask 523264   ;;  %s1962_s17 = smov [#allocation7]  }
  0x2a   :  { %v1709_v10 = vpack.c.bf16 %v52_v9, %v51_v8  ;;  %v54_v12 = vld [vmem:[#allocation5 + $0x38] sm:$0xff]  ;;  %v55_v14 = vld [vmem:[#allocation5 + $0x40] sm:$0xff]  ;;  %v56_v15 = vld [vmem:[#allocation5 + $0x48] sm:$0xff]  ;;  %vm744_vm6 = vcmask 253952   ;;  %vm766_vm7 = vcmask 261120   ;;  %vm1029_vm8 = vcmask 122880  }
  0x2b   :  { %1704 = vmatpush3.bf16.msra.mxu0 %v1703_v5  ;;  %v1712_v13 = vpack.c.bf16 %v54_v12, %v53_v11  ;;  %v1715_v16 = vpack.c.bf16 %v56_v15, %v55_v14  ;;  %v57_v17 = vld [vmem:[#allocation5 + $0x50] sm:$0xff]  ;;  %v58_v18 = vld [vmem:[#allocation5 + $0x58] sm:$0xff]  ;;  %v59_v20 = vld [vmem:[#allocation5 + $0x60] sm:$0xff]  ;;  %vm1194_vm9 = vcmask 1041408   ;;  %vm1196_vm10 = vcmask 1042432   ;;  %s1337_s18 = sshll.u32 %s1962_s17, 4  ;;  %s1338_s18 = int_to_ptr.vmem [resolvable:$true] %s1337_s18 }
  0x2c   :  { %1705 = vmatprep.subr.bf16.mxu0 %v1957_v0  ;;  %v1718_v19 = vpack.c.bf16 %v58_v18, %v57_v17  ;;  %v60_v21 = vld [vmem:[#allocation5 + $0x68] sm:$0xff]  ;;  %v61_v23 = vld [vmem:[#allocation5 + $0x70] sm:$0xff]  ;;  %v62_v24 = vld [vmem:[#allocation5 + $0x78] sm:$0xff]  ;;  %vm1198_vm11 = vcmask 1043456   ;;  %vm1200_vm12 = vcmask 1044480   ;;  %vm1202_vm13 = vcmask 1045504   ;;  %p1930_p3 = scmp.lt.s32.totalorder %s1338_s18, %s1338_s18 }
  0x2d   :  { %v1721_v22 = vpack.c.bf16 %v60_v21, %v59_v20  ;;  %v1724_v25 = vpack.c.bf16 %v62_v24, %v61_v23  ;;  %v46_v26 = vld [vmem:[#allocation2] sm:$0x1]  ;;  %v152_v27 = vld [vmem:[#allocation5 + $0x80] sm:$0xff]  ;;  %v153_v28 = vld [vmem:[#allocation5 + $0x88] sm:$0xff]  ;;  %vm1204_vm14 = vcmask 1046528   ;;  %vm1049_vm15 = vcmask 130048  }
  0x2e   :  { %v154_v29 = vld [vmem:[#allocation5 + $0x90] sm:$0xff]  ;;  %v1727_v30 = vpack.c.bf16 %v153_v28, %v152_v27  ;;  %v155_v31 = vld [vmem:[#allocation5 + $0x98] sm:$0xff]  ;;  %v156_v41 = vld [vmem:[#allocation5 + $0xa0] sm:$0xff]  ;;  %s1925_s2 = scalar_lea.vmem %s1338_s18, 16 }
  0x2f   :  { %1707 = vmatpush3.bf16.msra.mxu0 %v1706_v7  ;;  %v1730_v32 = vpack.c.bf16 %v155_v31, %v154_v29  ;;  %v63_v33 = vld [vmem:[%s2268_s3] sm:$0x1]  ;;  %v157_v42 = vld [vmem:[#allocation5 + $0xa8] sm:$0xff]  ;;  %v158_v44 = vld [vmem:[#allocation5 + $0xb0] sm:$0xff]  ;;  %p1926_p2 = scmp.ne.s32.totalorder %s1338_s18, %s1925_s2 }
  0x30   :  { %1708 = vmatprep.subr.bf16.mxu0 %v1957_v0  ;;  %1728 = vmatpush3.bf16.msra.mxu1 %v1727_v30  ;;  %v1733_v43 = vpack.c.bf16 %v157_v42, %v156_v41  ;;  %v159_v45 = vld [vmem:[#allocation5 + $0xb8] sm:$0xff]  ;;  %v160_v47 = vld [vmem:[#allocation5 + $0xc0] sm:$0xff]  ;;  %v161_v48 = vld [vmem:[#allocation5 + $0xc8] sm:$0xff] }
  0x31   :  { %1729 = vmatprep.subr.bf16.mxu1 %v1957_v0  ;;  %v1736_v46 = vpack.c.bf16 %v159_v45, %v158_v44  ;;  %v1739_v49 = vpack.c.bf16 %v161_v48, %v160_v47  ;;  %v162_v50 = vld [vmem:[#allocation5 + $0xd0] sm:$0xff]  ;;  %v163_v51 = vld [vmem:[#allocation5 + $0xd8] sm:$0xff]  ;;  %v164_v53 = vld [vmem:[#allocation5 + $0xe0] sm:$0xff] }
  0x32   :  { %v1742_v52 = vpack.c.bf16 %v163_v51, %v162_v50  ;;  %v165_v54 = vld [vmem:[#allocation5 + $0xe8] sm:$0xff]  ;;  %v166_v56 = vld [vmem:[#allocation5 + $0xf0] sm:$0xff]  ;;  %v167_v57 = vld [vmem:[#allocation5 + $0xf8] sm:$0xff] }
  0x33   :  { %1710 = vmatpush3.bf16.msra.mxu0 %v1709_v10  ;;  %v1745_v55 = vpack.c.bf16 %v165_v54, %v164_v53  ;;  %v1748_v58 = vpack.c.bf16 %v167_v57, %v166_v56  ;;  %v168_v7 = vld [vmem:[%s2268_s3 + $0x1] sm:$0x1]  ;;  %v257_v15 = vld [vmem:[#allocation5 + $0x100] sm:$0xff]  ;;  %v259_v18 = vld [vmem:[#allocation5 + $0x110] sm:$0xff] }
  0x34   :  { %1711 = vmatprep.subr.bf16.mxu0 %v1957_v0  ;;  %1731 = vmatpush3.bf16.msra.mxu1 %v1730_v32  ;;  %v261_v21 = vld [vmem:[#allocation5 + $0x120] sm:$0xff]  ;;  %v263_v24 = vld [vmem:[#allocation5 + $0x130] sm:$0xff]  ;;  %v266_v28 = vld [vmem:[#allocation5 + $0x148] sm:$0xff] }
  0x35   :  { %1732 = vmatprep.subr.bf16.mxu1 %v1957_v0  ;;  %v265_v27 = vld [vmem:[#allocation5 + $0x140] sm:$0xff]  ;;  %v267_v30 = vld [vmem:[#allocation5 + $0x150] sm:$0xff]  ;;  %v268_v31 = vld [vmem:[#allocation5 + $0x158] sm:$0xff] }
  0x36   :  { %v1763_v29 = vpack.c.bf16 %v266_v28, %v265_v27  ;;  %v1766_v32 = vpack.c.bf16 %v268_v31, %v267_v30  ;;  %v361_v44 = vld [vmem:[#allocation5 + $0x168] sm:$0xff]  ;;  %v362_v54 = vld [vmem:[#allocation5 + $0x170] sm:$0xff]  ;;  %v364_v57 = vld [vmem:[#allocation5 + $0x180] sm:$0xff] }
  0x37   :  { %1713 = vmatpush3.bf16.msra.mxu0 %v1712_v13  ;;  %v466_v28 = vld [vmem:[#allocation5 + $0x1d0] sm:$0xff]  ;;  %v468_v31 = vld [vmem:[#allocation5 + $0x1e0] sm:$0xff] }
  0x38   :  { %1714 = vmatprep.subr.bf16.mxu0 %v1957_v0  ;;  %1734 = vmatpush3.bf16.msra.mxu1 %v1733_v43  ;;  %v360_v43 = vld [vmem:[#allocation5 + $0x160] sm:$0xff] }
  0x39   :  { %1735 = vmatprep.subr.bf16.mxu1 %v1957_v0  ;;  %v1769_v45 = vpack.c.bf16 %v361_v44, %v360_v43 }
  0x3b   :  { %1716 = vmatpush3.bf16.msra.mxu0 %v1715_v16  ;;  %v258_v16 = vld [vmem:[#allocation5 + $0x108] sm:$0xff] }
  0x3c   :  { %1717 = vmatprep.subr.bf16.mxu0 %v1957_v0  ;;  %1737 = vmatpush3.bf16.msra.mxu1 %v1736_v46  ;;  %v1751_v17 = vpack.c.bf16 %v258_v16, %v257_v15  ;;  %v269_v46 = vld [vmem:[%s2268_s3 + $0x2] sm:$0x1] }
  0x3d   :  { %1738 = vmatprep.subr.bf16.mxu1 %v1957_v0 }
  0x3f   :  { %1719 = vmatpush3.bf16.msra.mxu0 %v1718_v19  ;;  %v260_v19 = vld [vmem:[#allocation5 + $0x118] sm:$0xff] }
  0x40   :  { %1720 = vmatprep.subr.bf16.mxu0 %v1957_v0  ;;  %1740 = vmatpush3.bf16.msra.mxu1 %v1739_v49  ;;  %v1754_v20 = vpack.c.bf16 %v260_v19, %v259_v18 }
  0x41   :  { %1741 = vmatprep.subr.bf16.mxu1 %v1957_v0 }
  0x43   :  { %1722 = vmatpush3.bf16.msra.mxu0 %v1721_v22  ;;  %v262_v22 = vld [vmem:[#allocation5 + $0x128] sm:$0xff] }
  0x44   :  { %1723 = vmatprep.subr.bf16.mxu0 %v1957_v0  ;;  %1743 = vmatpush3.bf16.msra.mxu1 %v1742_v52  ;;  %v1757_v23 = vpack.c.bf16 %v262_v22, %v261_v21 }
  0x45   :  { %1744 = vmatprep.subr.bf16.mxu1 %v1957_v0 }
  0x47   :  { %1725 = vmatpush3.bf16.msra.mxu0 %v1724_v25  ;;  %v264_v25 = vld [vmem:[#allocation5 + $0x138] sm:$0xff] }
  0x48   :  { %1750 = vmatprep.subr.bf16.mxu0 %v1957_v0  ;;  %1746 = vmatpush3.bf16.msra.mxu1 %v1745_v55  ;;  %v363_v55 = vld [vmem:[#allocation5 + $0x178] sm:$0xff] }
  0x49   :  { %1747 = vmatprep.subr.bf16.mxu1 %v1957_v0  ;;  %v1772_v56 = vpack.c.bf16 %v363_v55, %v362_v54  ;;  %v563_v55 = vld [vmem:[#allocation5 + $0x200] sm:$0xff] }
  0x4a   :  { %1503 = vmatmul.mubr.f32.vlgmr.msra.gmra.mrb[0].mxu0 %v46_v26  ;;  %v1760_v26 = vpack.c.bf16 %v264_v25, %v263_v24  ;;  %v464_v25 = vld [vmem:[#allocation5 + $0x1c0] sm:$0xff] }
  0x4b   :  { %1564 = vmatprep.mubr.msk.f32.mxu0 %vm1958_vm0, %v1959_v1  ;;  %1752 = vmatpush3.bf16.msra.mxu0 %v1751_v17  ;;  %v372_v17 = vld [vmem:[%s2268_s3 + $0x3] sm:$0x1] }
  0x4c   :  { %1749 = vmatpush3.bf16.msra.mxu1 %v1748_v58  ;;  %1753 = vmatprep.subr.bf16.mxu0 %v1957_v0  ;;  %v365_v58 = vld [vmem:[#allocation5 + $0x188] sm:$0xff] }
  0x4d   :  { %1768 = vmatprep.subr.bf16.mxu1 %v1957_v0 }
  0x4f   :  { %1755 = vmatpush3.bf16.msra.mxu0 %v1754_v20 }
  0x50   :  { %1756 = vmatprep.subr.bf16.mxu0 %v1957_v0 }
  0x53   :  { %1758 = vmatpush3.bf16.msra.mxu0 %v1757_v23 }
  0x54   :  { %1759 = vmatprep.subr.bf16.mxu0 %v1957_v0 }
  0x57   :  { %1761 = vmatpush3.bf16.msra.mxu0 %v1760_v26  ;;  %v465_v26 = vld [vmem:[#allocation5 + $0x1c8] sm:$0xff] }
  0x58   :  { %1762 = vmatprep.subr.bf16.mxu0 %v1957_v0  ;;  %v1787_v27 = vpack.c.bf16 %v465_v26, %v464_v25  ;;  %v663_v26 = vld [vmem:[#allocation5 + $0x250] sm:$0xff] }
  0x5b   :  { %1764 = vmatpush3.bf16.msra.mxu0 %v1763_v29  ;;  %v467_v29 = vld [vmem:[#allocation5 + $0x1d8] sm:$0xff] }
  0x5c   :  { %1765 = vmatprep.subr.bf16.mxu0 %v1957_v0  ;;  %v1790_v30 = vpack.c.bf16 %v467_v29, %v466_v28  ;;  %v665_v29 = vld [vmem:[#allocation5 + $0x260] sm:$0xff] }
  0x5f   :  { %1767 = vmatpush3.bf16.msra.mxu0 %v1766_v32  ;;  %v469_v32 = vld [vmem:[#allocation5 + $0x1e8] sm:$0xff] }
  0x60   :  { %1786 = vmatprep.subr.bf16.mxu0 %v1957_v0 }
 0x11d   :  { %v130_v34 = vpop.f32.mrb[0].mxu0 }
 0x11e   :  { %v131_v35 = vadd.f32 %v130_v34, %v63_v33  ;;  %v1504_v36 = vpop.f32.mrb[1].mxu0 }
 0x120   :  { %v134_v37 = vmax.f32 %v131_v35, 0.0 }
 0x122   :  { %v136_v38 = vsel %vm135_vm1, %v134_v37, 0.0  ;;  %v141_v39 = vmul.f32 %v134_v37, %v134_v37 }
 0x123   :  { %137 = vadd.xlane.f32.xlu0 %v136_v38 }
 0x124   :  { %v142_v40 = vsel %vm135_vm1, %v141_v39, 0.0 }
 0x127   :  { %143 = vadd.xlane.f32.xlu0 %v142_v40 }
 0x1b0   :  { %v138_v59 = vpop.xlane.xlu0 %137 }
 0x1b1   :  { %v140_v60 = vmul.f32 0.0078125, %v138_v59  ;;  %v1775_v59 = vpack.c.bf16 %v365_v58, %v364_v57  ;;  %v565_v58 = vld [vmem:[#allocation5 + $0x210] sm:$0xff] }
 0x1b3   :  { %v146_v62 = vmul.f32 %v140_v60, %v140_v60  ;;  %v148_v4 = vsub.f32 %v134_v37, %v140_v60  ;;  %v366_v60 = vld [vmem:[#allocation5 + $0x190] sm:$0xff] }
 0x1b4   :  { %v144_v61 = vpop.xlane.xlu0 %143 }
 0x1b5   :  { %v145_v63 = vmul.f32 0.0078125, %v144_v61  ;;  %v367_v61 = vld [vmem:[#allocation5 + $0x198] sm:$0xff] }
 0x1b7   :  { %v147_v2 = vsub.f32 %v145_v63, %v146_v62  ;;  %v1778_v62 = vpack.c.bf16 %v367_v61, %v366_v60  ;;  %v368_v63 = vld [vmem:[#allocation5 + $0x1a0] sm:$0xff] }
 0x1b8   :  { %v567_v61 = vld [vmem:[#allocation5 + $0x220] sm:$0xff] }
 0x1b9   :  { %v149_v3 = vadd.f32 1e-05, %v147_v2  ;;  %v369_v2 = vld [vmem:[#allocation5 + $0x1a8] sm:$0xff] }
 0x1bb   :  { %1861 = vrsqrt.f32 %v149_v3  ;;  %v1781_v3 = vpack.c.bf16 %v369_v2, %v368_v63  ;;  %v569_v2 = vld [vmem:[#allocation5 + $0x230] sm:$0xff] }
 0x1c5   :  { %v1862_v5 = vpop.eup %1861 }
 0x1c6   :  { %v151_v6 = vmul.f32 %v1862_v5, %v148_v4  ;;  %v370_v4 = vld [vmem:[#allocation5 + $0x1b0] sm:$0xff]  ;;  %v371_v5 = vld [vmem:[#allocation5 + $0x1b8] sm:$0xff] }
 0x1c8   :  { %1538 = vmatmul.mubr.f32.vlgmr.msra.gmra.mrb[0].mxu1 %v151_v6  ;;  %v1784_v6 = vpack.c.bf16 %v371_v5, %v370_v4 }
 0x1c9   :  { %1591 = vmatprep.mubr.msk.f32.mxu1 %vm1958_vm0, %v1959_v1  ;;  %1770 = vmatpush3.bf16.msra.mxu1 %v1769_v45 }
 0x1ca   :  { %1771 = vmatprep.subr.bf16.mxu1 %v1957_v0 }
 0x1cd   :  { %1773 = vmatpush3.bf16.msra.mxu1 %v1772_v56  ;;  %v564_v56 = vld [vmem:[#allocation5 + $0x208] sm:$0xff] }
 0x1ce   :  { %1774 = vmatprep.subr.bf16.mxu1 %v1957_v0  ;;  %v1799_v57 = vpack.c.bf16 %v564_v56, %v563_v55  ;;  %v763_v55 = vld [vmem:[#allocation5 + $0x290] sm:$0xff] }
 0x1d1   :  { %1776 = vmatpush3.bf16.msra.mxu1 %v1775_v59  ;;  %v566_v59 = vld [vmem:[#allocation5 + $0x218] sm:$0xff] }
 0x1d2   :  { %1777 = vmatprep.subr.bf16.mxu1 %v1957_v0  ;;  %v1802_v60 = vpack.c.bf16 %v566_v59, %v565_v58 }
 0x1d5   :  { %1779 = vmatpush3.bf16.msra.mxu1 %v1778_v62  ;;  %v568_v62 = vld [vmem:[#allocation5 + $0x228] sm:$0xff] }
 0x1d6   :  { %1780 = vmatprep.subr.bf16.mxu1 %v1957_v0  ;;  %v1805_v63 = vpack.c.bf16 %v568_v62, %v567_v61 }
 0x1d9   :  { %1782 = vmatpush3.bf16.msra.mxu1 %v1781_v3  ;;  %v570_v3 = vld [vmem:[#allocation5 + $0x238] sm:$0xff] }
 0x1da   :  { %1783 = vmatprep.subr.bf16.mxu1 %v1957_v0  ;;  %v1808_v4 = vpack.c.bf16 %v570_v3, %v569_v2 }
 0x1dd   :  { %1785 = vmatpush3.bf16.msra.mxu1 %v1784_v6 }
 0x1de   :  { %1798 = vmatprep.subr.bf16.mxu1 %v1957_v0 }
 0x29b   :  { %v235_v8 = vpop.f32.mrb[0].mxu1 }
 0x29c   :  { %v236_v9 = vadd.f32 %v235_v8, %v168_v7  ;;  %v1539_v10 = vpop.f32.mrb[1].mxu1 }
 0x29e   :  { %v239_v11 = vmax.f32 %v236_v9, 0.0 }
 0x2a0   :  { %v241_v12 = vsel %vm240_vm2, %v239_v11, 0.0  ;;  %v246_v13 = vmul.f32 %v239_v11, %v239_v11 }
 0x2a1   :  { %242 = vadd.xlane.f32.xlu1 %v241_v12 }
 0x2a2   :  { %v247_v14 = vsel %vm240_vm2, %v246_v13, 0.0 }
 0x2a5   :  { %248 = vadd.xlane.f32.xlu1 %v247_v14 }
 0x32e   :  { %v243_v33 = vpop.xlane.xlu1 %242 }
 0x32f   :  { %v245_v34 = vmul.f32 0.010416667, %v243_v33  ;;  %v1793_v33 = vpack.c.bf16 %v469_v32, %v468_v31  ;;  %v667_v32 = vld [vmem:[#allocation5 + $0x270] sm:$0xff] }
 0x331   :  { %v251_v36 = vmul.f32 %v245_v34, %v245_v34  ;;  %v253_v40 = vsub.f32 %v239_v11, %v245_v34  ;;  %v470_v34 = vld [vmem:[#allocation5 + $0x1f0] sm:$0xff] }
 0x332   :  { %v249_v35 = vpop.xlane.xlu1 %248 }
 0x333   :  { %v250_v37 = vmul.f32 0.010416667, %v249_v35  ;;  %v471_v35 = vld [vmem:[#allocation5 + $0x1f8] sm:$0xff] }
 0x335   :  { %v252_v38 = vsub.f32 %v250_v37, %v251_v36  ;;  %v1796_v36 = vpack.c.bf16 %v471_v35, %v470_v34 }
 0x337   :  { %v254_v39 = vadd.f32 1e-05, %v252_v38 }
 0x339   :  { %1863 = vrsqrt.f32 %v254_v39 }
 0x343   :  { %v1864_v41 = vpop.eup %1863 }
 0x344   :  { %v256_v42 = vmul.f32 %v1864_v41, %v253_v40 }
 0x346   :  { %1565 = vmatmul.mubr.msk.f32.vlgmr.msra.gmra.mrb[2].mxu0 %vm270_vm3, %v256_v42 }
 0x347   :  { %1610 = vmatprep.mubr.msk.f32.mxu0 %vm1958_vm0, %v1959_v1  ;;  %1788 = vmatpush3.bf16.msra.mxu0 %v1787_v27  ;;  %v664_v27 = vld [vmem:[#allocation5 + $0x258] sm:$0xff] }
 0x348   :  { %1789 = vmatprep.subr.bf16.mxu0 %v1957_v0  ;;  %v1814_v28 = vpack.c.bf16 %v664_v27, %v663_v26 }
 0x34b   :  { %1791 = vmatpush3.bf16.msra.mxu0 %v1790_v30  ;;  %v666_v30 = vld [vmem:[#allocation5 + $0x268] sm:$0xff] }
 0x34c   :  { %1792 = vmatprep.subr.bf16.mxu0 %v1957_v0  ;;  %v1817_v31 = vpack.c.bf16 %v666_v30, %v665_v29 }
 0x34f   :  { %1794 = vmatpush3.bf16.msra.mxu0 %v1793_v33  ;;  %v668_v33 = vld [vmem:[#allocation5 + $0x278] sm:$0xff] }
 0x350   :  { %1795 = vmatprep.subr.bf16.mxu0 %v1957_v0  ;;  %v1820_v34 = vpack.c.bf16 %v668_v33, %v667_v32 }
 0x353   :  { %1797 = vmatpush3.bf16.msra.mxu0 %v1796_v36 }
 0x354   :  { %1810 = vmatprep.subr.bf16.mxu0 %v1957_v0 }
 0x419   :  { %v340_v47 = vpop.f32.mrb[2].mxu0 }
 0x41a   :  { %v341_v48 = vadd.f32 %v340_v47, %v269_v46  ;;  %v1566_v49 = vpop.f32.mrb[3].mxu0  ;;  %v472_v47 = vld [vmem:[%s2268_s3 + $0x4] sm:$0x1] }
 0x41c   :  { %v344_v50 = vmax.f32 %v341_v48, 0.0 }
 0x41e   :  { %v345_v51 = vsel %vm240_vm2, %v344_v50, 0.0  ;;  %v349_v52 = vmul.f32 %v344_v50, %v344_v50 }
 0x41f   :  { %346 = vadd.xlane.f32.xlu0 %v345_v51 }
 0x420   :  { %v350_v53 = vsel %vm240_vm2, %v349_v52, 0.0 }
 0x421   :  { %351 = vadd.xlane.f32.xlu1 %v350_v53 }
 0x4ac   :  { %v347_v7 = vpop.xlane.xlu0 %346 }
 0x4ad   :  { %v348_v8 = vmul.f32 0.010416667, %v347_v7 }
 0x4ae   :  { %v352_v9 = vpop.xlane.xlu1 %351 }
 0x4af   :  { %v354_v10 = vmul.f32 %v348_v8, %v348_v8  ;;  %v353_v11 = vmul.f32 0.010416667, %v352_v9  ;;  %v356_v14 = vsub.f32 %v344_v50, %v348_v8 }
 0x4b1   :  { %v355_v12 = vsub.f32 %v353_v11, %v354_v10 }
 0x4b3   :  { %v357_v13 = vadd.f32 1e-05, %v355_v12 }
 0x4b5   :  { %1865 = vrsqrt.f32 %v357_v13 }
 0x4bf   :  { %v1866_v15 = vpop.eup %1865 }
 0x4c0   :  { %v359_v16 = vmul.f32 %v1866_v15, %v356_v14  ;;  %v571_v15 = vld [vmem:[%s2268_s3 + $0x5] sm:$0x1] }
 0x4c2   :  { %1592 = vmatmul.mubr.msk.f32.vlgmr.msra.gmra.mrb[2].mxu1 %vm270_vm3, %v359_v16  ;;  %vm1252_vm3 = vcmask 220160  }
 0x4c3   :  { %1629 = vmatprep.mubr.msk.f32.mxu1 %vm1958_vm0, %v1959_v1  ;;  %1800 = vmatpush3.bf16.msra.mxu1 %v1799_v57  ;;  %v764_v57 = vld [vmem:[#allocation5 + $0x298] sm:$0xff] }
 0x4c4   :  { %1801 = vmatprep.subr.bf16.mxu1 %v1957_v0  ;;  %v1826_v58 = vpack.c.bf16 %v764_v57, %v763_v55  ;;  %v954_v55 = vld [vmem:[%s2268_s3 + $0x9] sm:$0x1] }
 0x4c7   :  { %1803 = vmatpush3.bf16.msra.mxu1 %v1802_v60 }
 0x4c8   :  { %1804 = vmatprep.subr.bf16.mxu1 %v1957_v0 }
 0x4cb   :  { %1806 = vmatpush3.bf16.msra.mxu1 %v1805_v63 }
 0x4cc   :  { %1807 = vmatprep.subr.bf16.mxu1 %v1957_v0 }
 0x4cf   :  { %1809 = vmatpush3.bf16.msra.mxu1 %v1808_v4 }
 0x4d0   :  { %1822 = vmatprep.subr.bf16.mxu1 %v1957_v0 }
 0x595   :  { %v442_v18 = vpop.f32.mrb[2].mxu1 }
 0x596   :  { %v443_v19 = vadd.f32 %v442_v18, %v372_v17  ;;  %v1593_v20 = vpop.f32.mrb[3].mxu1 }
 0x598   :  { %v446_v21 = vmax.f32 %v443_v19, 0.0 }
 0x59a   :  { %v448_v22 = vsel %vm447_vm4, %v446_v21, 0.0  ;;  %v453_v23 = vmul.f32 %v446_v21, %v446_v21 }
 0x59b   :  { %449 = vadd.xlane.f32.xlu0 %v448_v22 }
 0x59c   :  { %v454_v24 = vsel %vm447_vm4, %v453_v23, 0.0  ;;  %v661_v23 = vld [vmem:[#allocation5 + $0x240] sm:$0xff] }
 0x59d   :  { %455 = vadd.xlane.f32.xlu1 %v454_v24  ;;  %v662_v24 = vld [vmem:[#allocation5 + $0x248] sm:$0xff] }
 0x59e   :  { %v1811_v25 = vpack.c.bf16 %v662_v24, %v661_v23 }
 0x628   :  { %v450_v37 = vpop.xlane.xlu0 %449 }
 0x629   :  { %v452_v38 = vmul.f32 0.015625, %v450_v37 }
 0x62a   :  { %v456_v39 = vpop.xlane.xlu1 %455 }
 0x62b   :  { %v458_v40 = vmul.f32 %v452_v38, %v452_v38  ;;  %v457_v41 = vmul.f32 0.015625, %v456_v39  ;;  %v460_v44 = vsub.f32 %v446_v21, %v452_v38 }
 0x62d   :  { %v459_v42 = vsub.f32 %v457_v41, %v458_v40 }
 0x62f   :  { %v461_v43 = vadd.f32 1e-05, %v459_v42 }
 0x631   :  { %1867 = vrsqrt.f32 %v461_v43 }
 0x63b   :  { %v1868_v45 = vpop.eup %1867 }
 0x63c   :  { %v463_v46 = vmul.f32 %v1868_v45, %v460_v44  ;;  %v669_v45 = vld [vmem:[%s2268_s3 + $0x6] sm:$0x1] }
 0x63e   :  { %1611 = vmatmul.mubr.msk.f32.vlgmr.msra.gmra.mrb[4].mxu0 %vm473_vm5, %v463_v46 }
 0x63f   :  { %1648 = vmatprep.mubr.msk.f32.mxu0 %vm1958_vm0, %v1959_v1  ;;  %1812 = vmatpush3.bf16.msra.mxu0 %v1811_v25 }
 0x640   :  { %1813 = vmatprep.subr.bf16.mxu0 %v1957_v0 }
 0x643   :  { %1815 = vmatpush3.bf16.msra.mxu0 %v1814_v28 }
 0x644   :  { %1816 = vmatprep.subr.bf16.mxu0 %v1957_v0 }
 0x647   :  { %1818 = vmatpush3.bf16.msra.mxu0 %v1817_v31  ;;  %v860_v31 = vld [vmem:[%s2268_s3 + $0x8] sm:$0x1] }
 0x648   :  { %1819 = vmatprep.subr.bf16.mxu0 %v1957_v0 }
 0x64b   :  { %1821 = vmatpush3.bf16.msra.mxu0 %v1820_v34 }
 0x64c   :  { %1834 = vmatprep.subr.bf16.mxu0 %v1957_v0 }
 0x711   :  { %v543_v48 = vpop.f32.mrb[4].mxu0 }
 0x712   :  { %v544_v49 = vadd.f32 %v543_v48, %v472_v47  ;;  %v1612_v50 = vpop.f32.mrb[5].mxu0 }
 0x714   :  { %v547_v51 = vmax.f32 %v544_v49, 0.0 }
 0x716   :  { %v548_v52 = vsel %vm447_vm4, %v547_v51, 0.0  ;;  %v552_v53 = vmul.f32 %v547_v51, %v547_v51 }
 0x717   :  { %549 = vadd.xlane.f32.xlu0 %v548_v52 }
 0x718   :  { %v553_v54 = vsel %vm447_vm4, %v552_v53, 0.0  ;;  %v761_v53 = vld [vmem:[#allocation5 + $0x280] sm:$0xff] }
 0x719   :  { %554 = vadd.xlane.f32.xlu1 %v553_v54  ;;  %v762_v54 = vld [vmem:[#allocation5 + $0x288] sm:$0xff] }
 0x71a   :  { %v1823_v56 = vpack.c.bf16 %v762_v54, %v761_v53 }
 0x7a4   :  { %v550_v5 = vpop.xlane.xlu0 %549 }
 0x7a5   :  { %v551_v6 = vmul.f32 0.015625, %v550_v5 }
 0x7a6   :  { %v555_v7 = vpop.xlane.xlu1 %554 }
 0x7a7   :  { %v557_v8 = vmul.f32 %v551_v6, %v551_v6  ;;  %v556_v9 = vmul.f32 0.015625, %v555_v7  ;;  %v559_v12 = vsub.f32 %v547_v51, %v551_v6  ;;  %v765_v7 = vld [vmem:[%s2268_s3 + $0x7] sm:$0x1] }
 0x7a9   :  { %v558_v10 = vsub.f32 %v556_v9, %v557_v8 }
 0x7ab   :  { %v560_v11 = vadd.f32 1e-05, %v558_v10 }
 0x7ad   :  { %1869 = vrsqrt.f32 %v560_v11 }
 0x7b7   :  { %v1870_v13 = vpop.eup %1869 }
 0x7b8   :  { %v562_v14 = vmul.f32 %v1870_v13, %v559_v12 }
 0x7ba   :  { %1630 = vmatmul.mubr.msk.f32.vlgmr.msra.gmra.mrb[4].mxu1 %vm473_vm5, %v562_v14 }
 0x7bb   :  { %1659 = vmatprep.mubr.msk.f32.mxu1 %vm1958_vm0, %v1959_v1  ;;  %1824 = vmatpush3.bf16.msra.mxu1 %v1823_v56 }
 0x7bc   :  { %1825 = vmatprep.subr.bf16.mxu1 %v1957_v0 }
 0x7bf   :  { %1827 = vmatpush3.bf16.msra.mxu1 %v1826_v58 }
 0x7c0   :  { %1828 = vmatprep.subr.bf16.mxu1 %v1957_v0 }
 0x88d   :  { %v641_v16 = vpop.f32.mrb[4].mxu1 }
 0x88e   :  { %v642_v17 = vadd.f32 %v641_v16, %v571_v15  ;;  %v1631_v18 = vpop.f32.mrb[5].mxu1  ;;  %v856_v15 = vld [vmem:[#allocation5 + $0x2a0] sm:$0xff]  ;;  %v857_v16 = vld [vmem:[#allocation5 + $0x2a8] sm:$0xff] }
 0x88f   :  { %v1829_v18 = vpack.c.bf16 %v857_v16, %v856_v15 }
 0x890   :  { %v645_v19 = vmax.f32 %v642_v17, 0.0  ;;  %v858_v17 = vld [vmem:[#allocation5 + $0x2b0] sm:$0xff] }
 0x892   :  { %v646_v20 = vsel %vm447_vm4, %v645_v19, 0.0  ;;  %v650_v21 = vmul.f32 %v645_v19, %v645_v19 }
 0x893   :  { %647 = vadd.xlane.f32.xlu0 %v646_v20 }
 0x894   :  { %v651_v22 = vsel %vm447_vm4, %v650_v21, 0.0 }
 0x895   :  { %652 = vadd.xlane.f32.xlu1 %v651_v22 }
 0x920   :  { %v648_v35 = vpop.xlane.xlu0 %647 }
 0x921   :  { %v649_v36 = vmul.f32 0.015625, %v648_v35 }
 0x922   :  { %v653_v37 = vpop.xlane.xlu1 %652 }
 0x923   :  { %v655_v38 = vmul.f32 %v649_v36, %v649_v36  ;;  %v654_v39 = vmul.f32 0.015625, %v653_v37  ;;  %v657_v42 = vsub.f32 %v645_v19, %v649_v36  ;;  %v859_v19 = vld [vmem:[#allocation5 + $0x2b8] sm:$0xff] }
 0x924   :  { %v1832_v20 = vpack.c.bf16 %v859_v19, %v858_v17 }
 0x925   :  { %v656_v40 = vsub.f32 %v654_v39, %v655_v38  ;;  %v950_v39 = vld [vmem:[#allocation5 + $0x2c0] sm:$0xff] }
 0x927   :  { %v658_v41 = vadd.f32 1e-05, %v656_v40  ;;  %v951_v40 = vld [vmem:[#allocation5 + $0x2c8] sm:$0xff] }
 0x929   :  { %1871 = vrsqrt.f32 %v658_v41  ;;  %v952_v41 = vld [vmem:[#allocation5 + $0x2d0] sm:$0xff] }
 0x933   :  { %v1872_v43 = vpop.eup %1871 }
 0x934   :  { %v660_v44 = vmul.f32 %v1872_v43, %v657_v42  ;;  %v1835_v42 = vpack.c.bf16 %v951_v40, %v950_v39  ;;  %v953_v43 = vld [vmem:[#allocation5 + $0x2d8] sm:$0xff] }
 0x936   :  { %1649 = vmatmul.mubr.msk.f32.vlgmr.msra.gmra.mrb[6].mxu0 %vm473_vm5, %v660_v44  ;;  %v1838_v44 = vpack.c.bf16 %v953_v43, %v952_v41 }
 0x937   :  { %1681 = vmatprep.mubr.msk.f32.mxu0 %vm1958_vm0, %v1959_v1  ;;  %1836 = vmatpush3.bf16.msra.mxu0 %v1835_v42 }
 0x938   :  { %1837 = vmatprep.subr.bf16.mxu0 %v1957_v0 }
 0x93b   :  { %1839 = vmatpush3.bf16.msra.mxu0 %v1838_v44 }
 0xa09   :  { %v739_v46 = vpop.f32.mrb[6].mxu0 }
 0xa0a   :  { %v740_v47 = vadd.f32 %v739_v46, %v669_v45  ;;  %v1650_v48 = vpop.f32.mrb[7].mxu0 }
 0xa0c   :  { %v743_v49 = vmax.f32 %v740_v47, 0.0 }
 0xa0e   :  { %v745_v50 = vsel %vm744_vm6, %v743_v49, 0.0  ;;  %v750_v51 = vmul.f32 %v743_v49, %v743_v49 }
 0xa0f   :  { %746 = vadd.xlane.f32.xlu0 %v745_v50 }
 0xa10   :  { %v751_v52 = vsel %vm744_vm6, %v750_v51, 0.0 }
 0xa11   :  { %752 = vadd.xlane.f32.xlu1 %v751_v52 }
 0xa9c   :  { %v747_v59 = vpop.xlane.xlu0 %746 }
 0xa9d   :  { %v749_v60 = vmul.f32 0.03125, %v747_v59 }
 0xa9e   :  { %v753_v61 = vpop.xlane.xlu1 %752 }
 0xa9f   :  { %v755_v62 = vmul.f32 %v749_v60, %v749_v60  ;;  %v754_v63 = vmul.f32 0.03125, %v753_v61  ;;  %v757_v4 = vsub.f32 %v743_v49, %v749_v60 }
 0xaa1   :  { %v756_v2 = vsub.f32 %v754_v63, %v755_v62  ;;  %v1046_v63 = vld [vmem:[#allocation5 + $0x2e0] sm:$0xff] }
 0xaa3   :  { %v758_v3 = vadd.f32 1e-05, %v756_v2  ;;  %v1047_v2 = vld [vmem:[#allocation5 + $0x2e8] sm:$0xff] }
 0xaa5   :  { %1873 = vrsqrt.f32 %v758_v3  ;;  %v1841_v3 = vpack.c.bf16 %v1047_v2, %v1046_v63 }
 0xaaf   :  { %v1874_v5 = vpop.eup %1873 }
 0xab0   :  { %v760_v6 = vmul.f32 %v1874_v5, %v757_v4  ;;  %v2158_v4 = vld [vmem:[%s2266_s1] sm:$0x3] }
 0xab1   :  { %v2162_v5 = vmul.f32 %v2158_v4, %v2158_v4 }
 0xab2   :  { %1660 = vmatmul.mubr.msk.f32.vlgmr.msra.gmra.mrb[6].mxu1 %vm766_vm7, %v760_v6 }
 0xab3   :  { %1670 = vmatprep.mubr.msk.f32.mxu1 %vm1958_vm0, %v1959_v1  ;;  %1830 = vmatpush3.bf16.msra.mxu1 %v1829_v18  ;;  %v2166_v6 = vmul.f32 %v2162_v5, %v2158_v4  ;;  %v1162_v15 = vrot.slane %v2162_v5, 7 }
 0xab4   :  { %1831 = vmatprep.subr.bf16.mxu1 %v1957_v0 }
 0xab7   :  { %1833 = vmatpush3.bf16.msra.mxu1 %v1832_v20 }
 0xab8   :  { %1840 = vmatprep.subr.bf16.mxu1 %v1957_v0 }
 0xb85   :  { %v836_v8 = vpop.f32.mrb[6].mxu1 }
 0xb86   :  { %v837_v9 = vadd.f32 %v836_v8, %v765_v7  ;;  %v1661_v10 = vpop.f32.mrb[7].mxu1  ;;  %v2169_v7 = vrot.slane %v2166_v6, 1  ;;  %v2172_v8 = vrot.slane %v2158_v4, 1 }
 0xb88   :  { %v840_v11 = vmax.f32 %v837_v9, 0.0  ;;  %v2175_v9 = vrot.slane %v2162_v5, 1  ;;  %v1142_v10 = vmul.f32 %v2169_v7, %v2158_v4  ;;  %v1144_v19 = vmul.f32 %v2172_v8, %v2166_v6 }
 0xb89   :  { %v1138_v42 = vmul.f32 %v2172_v8, %v2162_v5 }
 0xb8a   :  { %v841_v12 = vsel %vm744_vm6, %v840_v11, 0.0  ;;  %v845_v13 = vmul.f32 %v840_v11, %v840_v11  ;;  %v1178_v16 = vrot.slane %v1142_v10, 6 }
 0xb8b   :  { %842 = vadd.xlane.f32.xlu0 %v841_v12  ;;  %v1160_v12 = vrot.slane %v2158_v4, 7 }
 0xb8c   :  { %v846_v14 = vsel %vm744_vm6, %v845_v13, 0.0  ;;  %v1133_v13 = vmul.f32 %v2172_v8, %v2158_v4 }
 0xb8d   :  { %847 = vadd.xlane.f32.xlu1 %v846_v14  ;;  %v1143_v14 = vmul.f32 %v2175_v9, %v2162_v5  ;;  %v1193_v17 = vsel %vm135_vm1, %v2172_v8, %v1160_v12 }
 0xc18   :  { %v843_v21 = vpop.xlane.xlu0 %842 }
 0xc19   :  { %v844_v22 = vmul.f32 0.03125, %v843_v21  ;;  %v1165_v21 = vrot.slane %v1133_v13, 5 }
 0xc1a   :  { %v848_v23 = vpop.xlane.xlu1 %847 }
 0xc1b   :  { %v850_v24 = vmul.f32 %v844_v22, %v844_v22  ;;  %v849_v25 = vmul.f32 0.03125, %v848_v23  ;;  %v852_v28 = vsub.f32 %v840_v11, %v844_v22  ;;  %v2181_v11 = vmul.f32 %v2166_v6, %v2158_v4 }
 0xc1c   :  { %v1181_v22 = vrot.slane %v1143_v14, 5 }
 0xc1d   :  { %v851_v26 = vsub.f32 %v849_v25, %v850_v24  ;;  %v1206_v18 = vsel %vm135_vm1, %v2166_v6, %v2181_v11  ;;  %v1195_v24 = vsel %vm1194_vm9, %v1193_v17, %v1162_v15 }
 0xc1e   :  { %v1207_v25 = vsel %vm1194_vm9, %v1206_v18, %v1178_v16  ;;  %v1157_v16 = vmul.f32 %v2169_v7, %v2166_v6 }
 0xc1f   :  { %v853_v27 = vadd.f32 1e-05, %v851_v26 }
 0xc21   :  { %1875 = vrsqrt.f32 %v853_v27 }
 0xc2b   :  { %v1876_v29 = vpop.eup %1875 }
 0xc2c   :  { %v855_v30 = vmul.f32 %v1876_v29, %v852_v28  ;;  %v1167_v29 = vrot.slane %v2162_v5, 4 }
 0xc2e   :  { %1671 = vmatmul.mubr.msk.f32.vlgmr.msra.gmra.mrb[8].mxu1 %vm766_vm7, %v855_v30  ;;  %v1184_v30 = vrot.slane %v1144_v19, 4 }
 0xc2f   :  { %1688 = vmatprep.mubr.msk.f32.mxu1 %vm1958_vm0, %v1959_v1  ;;  %1842 = vmatpush3.bf16.msra.mxu1 %v1841_v3 }
 0xc30   :  { %1843 = vmatprep.subr.bf16.mxu1 %v1957_v0 }
 0xd01   :  { %v930_v32 = vpop.f32.mrb[8].mxu1 }
 0xd02   :  { %v931_v33 = vadd.f32 %v930_v32, %v860_v31  ;;  %v1672_v34 = vpop.f32.mrb[9].mxu1  ;;  %v1146_v31 = vrot.slane %v2181_v11, 1  ;;  %v1197_v32 = vsel %vm1196_vm10, %v1195_v24, %v1165_v21  ;;  %v1231_v21 = vrot.slane %v1157_v16, 1 }
 0xd03   :  { %v1199_v40 = vsel %vm1198_vm11, %v1197_v32, %v1167_v29 }
 0xd04   :  { %v934_v35 = vmax.f32 %v931_v33, 0.0  ;;  %v1208_v33 = vsel %vm1196_vm10, %v1207_v25, %v1181_v22  ;;  %v1148_v43 = vmul.f32 %v1146_v31, %v2158_v4  ;;  %v1156_v2 = vmul.f32 %v1146_v31, %v2162_v5 }
 0xd05   :  { %v1209_v41 = vsel %vm1198_vm11, %v1208_v33, %v1184_v30 }
 0xd06   :  { %v935_v36 = vsel %vm744_vm6, %v934_v35, 0.0  ;;  %v939_v37 = vmul.f32 %v934_v35, %v934_v35  ;;  %v1228_v13 = vrot.slane %v1156_v2, 2 }
 0xd07   :  { %936 = vadd.xlane.f32.xlu0 %v935_v36  ;;  %v1137_v36 = vmul.f32 %v2175_v9, %v2158_v4 }
 0xd08   :  { %v940_v38 = vsel %vm744_vm6, %v939_v37, 0.0  ;;  %v1169_v37 = vrot.slane %v2166_v6, 4 }
 0xd09   :  { %941 = vadd.xlane.f32.xlu1 %v940_v38  ;;  %v1186_v38 = vrot.slane %v2181_v11, 3  ;;  %v1172_v44 = vrot.slane %v1137_v36, 2 }
 0xd94   :  { %v937_v45 = vpop.xlane.xlu0 %936 }
 0xd95   :  { %v938_v46 = vmul.f32 0.03125, %v937_v45 }
 0xd96   :  { %v942_v47 = vpop.xlane.xlu1 %941 }
 0xd97   :  { %v944_v48 = vmul.f32 %v938_v46, %v938_v46  ;;  %v943_v49 = vmul.f32 0.03125, %v942_v47  ;;  %v946_v52 = vsub.f32 %v934_v35, %v938_v46  ;;  %v1128_v35 = vmul.f32 %v2181_v11, %v2158_v4 }
 0xd98   :  { %v1201_v46 = vsel %vm1200_vm12, %v1199_v40, %v1169_v37  ;;  %v1210_v47 = vsel %vm1200_vm12, %v1209_v41, %v1186_v38 }
 0xd99   :  { %v945_v50 = vsub.f32 %v943_v49, %v944_v48  ;;  %v1188_v45 = vrot.slane %v1128_v35, 3  ;;  %v1175_v48 = vrot.slane %v1138_v42, 1  ;;  %v1191_v49 = vrot.slane %v1148_v43, 1 }
 0xd9a   :  { %v1153_v3 = vrot.slane %v1128_v35, 1  ;;  %v1219_v12 = vrot.slane %v1128_v35, 5  ;;  %v1159_v14 = vmul.f32 %v2172_v8, %v1128_v35 }
 0xd9b   :  { %v947_v51 = vadd.f32 1e-05, %v945_v50  ;;  %v1203_v50 = vsel %vm1202_vm13, %v1201_v46, %v1172_v44 }
 0xd9c   :  { %v1155_v10 = vmul.f32 %v1153_v3, %v2158_v4  ;;  %v1234_v19 = vrot.slane %v1159_v14, 7 }
 0xd9d   :  { %1877 = vrsqrt.f32 %v947_v51  ;;  %v1211_v51 = vsel %vm1202_vm13, %v1210_v47, %v1188_v45 }
 0xd9e   :  { %v1225_v17 = vrot.slane %v1155_v10, 3 }
 0xda7   :  { %v1878_v53 = vpop.eup %1877 }
 0xda8   :  { %v949_v54 = vmul.f32 %v1878_v53, %v946_v52  ;;  %v1205_v52 = vsel %vm1204_vm14, %v1203_v50, %v1175_v48  ;;  %v1212_v53 = vsel %vm1204_vm14, %v1211_v51, %v1191_v49 }
 0xdaa   :  { %1682 = vmatmul.mubr.msk.f32.vlgmr.msra.gmra.mrb[8].mxu0 %vm766_vm7, %v949_v54 }
 0xe7d   :  { %v1024_v56 = vpop.f32.mrb[8].mxu0 }
 0xe7e   :  { %v1025_v57 = vadd.f32 %v1024_v56, %v954_v55  ;;  %v1683_v58 = vpop.f32.mrb[9].mxu0  ;;  %v1844_v56 = vpack.c.bf16 %v1212_v53, %v1205_v52 }
 0xe7f   :  { %v1150_v58 = vmul.f32 %v2175_v9, %v2166_v6 }
 0xe80   :  { %v2149_v59 = vmax.f32 %v1025_v57, 0.0 }
 0xe82   :  { %v1030_v60 = vsel %vm1029_vm8, %v2149_v59, 0.0  ;;  %v1035_v61 = vmul.f32 %v2149_v59, %v2149_v59 }
 0xe83   :  { %1031 = vadd.xlane.f32.xlu0 %v1030_v60  ;;  %v1151_v60 = vmul.f32 %v2172_v8, %v2181_v11 }
 0xe84   :  { %v1036_v62 = vsel %vm1029_vm8, %v1035_v61, 0.0  ;;  %v1214_v61 = vrot.slane %v1150_v58, 7 }
 0xe85   :  { %1037 = vadd.xlane.f32.xlu1 %v1036_v62  ;;  %v1217_v62 = vrot.slane %v1151_v60, 6 }
 0xf10   :  { %v1032_v20 = vpop.xlane.xlu0 %1031 }
 0xf11   :  { %v1034_v23 = vmul.f32 0.0625, %v1032_v20 }
 0xf12   :  { %v1038_v26 = vpop.xlane.xlu1 %1037 }
 0xf13   :  { %v1040_v27 = vmul.f32 %v1034_v23, %v1034_v23  ;;  %v1039_v28 = vmul.f32 0.0625, %v1038_v26  ;;  %v1042_v54 = vsub.f32 %v2149_v59, %v1034_v23  ;;  %v1149_v59 = vmul.f32 %v2169_v7, %v2162_v5 }
 0xf14   :  { %v1158_v5 = vmul.f32 %v2175_v9, %v2181_v11  ;;  %v1961_v9 = vmov 33   ;;  %v1048_v11 = vld [vmem:[%s2268_s3 + $0xa] sm:$0x1]  ;;  %s1929_s3 = scalar_lea.vmem %s1338_s18, 32 }
 0xf15   :  { %v1041_v34 = vsub.f32 %v1039_v28, %v1040_v27  ;;  %v1238_v63 = vsel %vm135_vm1, %v1149_v59, %v1214_v61  ;;  %1860 = vset.pattern.permute.xlu0 %v1961_v9  ;;  %p1931_p4 = scmp.lt.s32.totalorder %s1929_s3, %s1925_s2 }
 0xf16   :  { %v1245_v8 = vsel %vm135_vm1, %v1158_v5, %v1234_v19 }
 0xf17   :  { %v1043_v39 = vadd.f32 1e-05, %v1041_v34  ;;  %p1932_p5 = por %p1931_p4, %p1930_p3 }
 0xf19   :  { %1879 = vrsqrt.f32 %v1043_v39  ;;  %p1933_p6 = pnand %p1932_p5, %p1926_p2 }
 0xf23   :  { %v1880_v55 = vpop.eup %1879 }
 0xf24   :  { %v1045_v57 = vmul.f32 %v1880_v55, %v1042_v54 }
 0xf26   :  { %1689 = vmatmul.mubr.msk.f32.vlgmr.msra.gmra.mrb[10].mxu1 %vm1049_vm15, %v1045_v57 }
 0xf27   :  { %1845 = vmatpush3.bf16.msra.mxu1 %v1844_v56  ;;  %1699 = vmatprep.mubr.msk.f32.mxu1 %vm1958_vm0, %v1959_v1  ;;  %v1239_v1 = vsel %vm1194_vm9, %v1238_v63, %v1217_v62  ;;  %vm1960_vm0 = vmmov 1  }
 0xf28   :  { %1846 = vmatprep.subr.bf16.mxu1 %v1957_v0  ;;  %v1129_v0 = vmul.f32 %v1128_v35, %v2158_v4  ;;  %v1240_v18 = vsel %vm1196_vm10, %v1239_v1, %v1219_v12  ;;  %vm1848_vm2 = vmpackc.low %vm1196_vm10, %vm1960_vm0 }
 0xf2a   :  { %v1222_v15 = vrot.slane %v1129_v0, 5  ;;  %v1236_v22 = vrot.slane %v1129_v0, 6 }
 0xf2c   :  { %v1241_v20 = vsel %vm1198_vm11, %v1240_v18, %v1222_v15  ;;  %v1246_v6 = vsel %vm1194_vm9, %v1245_v8, %v1236_v22 }
 0xf2d   :  { %v1242_v4 = vsel %vm1200_vm12, %v1241_v20, %v1225_v17 }
 0xf2e   :  { %v1243_v23 = vsel %vm1202_vm13, %v1242_v4, %v1228_v13 }
 0xf2f   :  { %v1244_v24 = vsel %vm1204_vm14, %v1243_v23, %v1231_v21 }
 0xf30   :  { %v1847_v7 = vpack.c.bf16 %v1246_v6, %v1244_v24 }
 0xf32   :  { %1849 = vmatpush3.bf16.msk.msra.mxu1 %vm1848_vm2, %v1847_v7 }
 0xff9   :  { %v1119_v25 = vpop.f32.mrb[10].mxu1 }
 0xffa   :  { %v1120_v26 = vadd.f32 %v1119_v25, %v1048_v11  ;;  %v1690_v27 = vpop.f32.mrb[11].mxu1 }
 0xffc   :  { %1123 = vst [vmem:[%s2269_s4] sm:$0x1] %v1120_v26  ;;  %1249 = vperm.xlu0 %1860, %v1120_v26   ;;  %1700 = vmatmul.mubr.msk.f32.vlgmr.msra.gmra.mrb[12].mxu1 %vm1252_vm3, %v1120_v26 }
0x107b   :  { %v1250_v28 = vpop.permute.xlu0 %1249 }
0x10cf   :  { %v1324_v29 = vpop.f32.mrb[12].mxu1 }
0x10d0   :  { %v1325_v30 = vadd.f32 %v1324_v29, %v1250_v28  ;;  %v1701_v31 = vpop.f32.mrb[13].mxu1 }
0x10d2   :  { %1328 = vst [vmem:[#allocation7] sm:$0x1] %v1325_v30 }
0x10d3   :  { %1936 = shalt.err (!%p1933_p6)
}
0x10d4   :  { %s1937_s20 = scalar_lea.hbm %s2270_s5, 16 }
0x10d5   :  { %p1938_p7 = scmp.ne.s32.totalorder %s2270_s5, %s1937_s20  ;;  %p1941_p8 = scmp.lt.u32.totalorder %s1937_s20, %s2270_s5 }
0x10d7   :  { %p1943_p9 = pnand %p1941_p8, %p1938_p7 }
0x10d9   :  { %1946 = shalt.err (!%p1943_p9)
}
0x10da   :  { %1340 = dma.vmem_to_hbm [thread:$0]  %s1338_s18, 16, %s2270_s5, [#allocation4]  }
0x10db   :  { %1951 = dma.done.wait [#allocation4], 16  }
0x10dc   :  { %1952 = vsyncadd [#allocation4], 4294967280 }
0x10dd   :  { %1346 = vsyncpa [#allocation3], 1 }
0x10de   :  { %1347 = vsyncpa [#allocation6], 1 }
0x10df   :  { %1348 = vsyncpa [#allocation4], 1 }

</bundles_post_ra>
